<compile_context>
chip_gen: v5e
topology: v5e:2x2
jax: 0.10.0
libtpu: 0.0.40
codegen_flags: <defaults>
</compile_context>

<pallas_src>
import jax
import jax.numpy as jnp
from jax.experimental import pallas as pl
from jax.experimental.pallas import tpu as pltpu


def _round_up(x, m):
    return ((x + m - 1) // m) * m


def _tile_bytes(shape, dtype):
    """Approximate VMEM bytes of a 2-D buffer after (sublane, lane) padding."""
    rows, cols = shape
    if dtype == jnp.bfloat16:
        item, sub = 2, 16
    else:
        item, sub = 4, 8
    return _round_up(max(int(rows), 1), sub) * _round_up(int(cols), 128) * item


def _vmem_capacity_bytes():
    try:
        info = pltpu.get_tpu_info()
        cap = getattr(info, "vmem_capacity_bytes", None)
        if cap:
            return int(cap)
    except Exception:
        pass
    return 64 * 1024 * 1024   # conservative fallback (v7x per-TensorCore VMEM)


def _vmem_footprint(TE, E_pad, NP, Fn, Fe, HP):
    bf16, f32 = jnp.bfloat16, jnp.float32
    blocked = [                                # double-buffered by the pipeline
        ((NP, Fn), bf16), ((TE, Fe), bf16), ((TE, NP), bf16), ((NP, TE), bf16),
        ((NP, 1), f32),
        ((Fn, HP), bf16), ((1, HP), f32), ((Fe, HP), bf16), ((1, HP), f32),
        ((HP, HP), bf16), ((1, HP), f32), ((HP, HP), bf16), ((1, HP), f32),
        ((1, HP), f32),                        # output tile
    ]
    scratch = [((E_pad, HP), bf16), ((NP, HP), bf16),
               ((NP, HP), f32), ((NP, HP), f32)]
    return (2 * sum(_tile_bytes(s, d) for s, d in blocked)
            + sum(_tile_bytes(s, d) for s, d in scratch))


def _circle_kernel(nf_ref, ef_ref, src_oh_ref, dstT_ref, inv_deg_ref,
                   wn0_ref, bn0_ref, we0_ref, be0_ref,
                   wn_ref, bn_ref, we_ref, be_ref,
                   out_ref,
                   h_scr, wk_scr, wprev_scr, wacc_scr):
    f32 = jnp.float32
    bf16 = jnp.bfloat16

    c = pl.program_id(0)            # circle index     (outer, sequential dependency)
    eb = pl.program_id(1)           # edge-block index (inner, scatter accumulation)
    n_c = pl.num_programs(0)
    n_eb = pl.num_programs(1)
    TE = src_oh_ref.shape[0]        # edge tile (static block shape)

    is_first_eb = eb == 0
    is_last_eb = eb == n_eb - 1
    is_first_c = c == 0
    is_last_c = c == n_c - 1

    row0 = pl.multiple_of(eb * TE, TE)   # start row of this edge block in h_scr

    # ---- once per circle (first edge block): zero scatter accumulator ----------
    @pl.when(is_first_eb)
    def _():
        wacc_scr[...] = jnp.zeros_like(wacc_scr)

    # ---- once per circle: node-side linear + relu (= GraphConv_nodes.forward) --
    @pl.when(jnp.logical_and(is_first_eb, is_first_c))
    def _():
        wk = jnp.dot(nf_ref[...], wn0_ref[...],
                     preferred_element_type=f32) + bn0_ref[...]
        wk_scr[...] = jnp.maximum(wk, 0.0).astype(wk_scr.dtype)

    @pl.when(jnp.logical_and(is_first_eb, jnp.logical_not(is_first_c)))
    def _():
        wk = jnp.dot(wprev_scr[...].astype(bf16), wn_ref[...],
                     preferred_element_type=f32) + bn_ref[...]
        wk_scr[...] = jnp.maximum(wk, 0.0).astype(wk_scr.dtype)

    # ---- gather wk[src[e]] for this edge block (0/1 one-hot matmul, exact) -----
    # TODO(synk): for large N replace with scalar-prefetch index gather.
    gathered = jnp.dot(src_oh_ref[...], wk_scr[...],
                       preferred_element_type=f32)             # [TE, HP] f32

    # ---- edge-side linear + relu; write h once and use the fresh value directly -
    def _store_message_scatter(h_new_f32):
        h_scr[pl.ds(row0, TE), :] = h_new_f32.astype(h_scr.dtype)   # bf16 carry
        m = (gathered * h_new_f32).astype(bf16)                     # messages
        wacc_scr[...] += jnp.dot(dstT_ref[...], m,                  # scatter-sum
                                 preferred_element_type=f32)

    @pl.when(is_first_c)
    def _():
        h = jnp.dot(ef_ref[...], we0_ref[...],
                    preferred_element_type=f32) + be0_ref[...]
        _store_message_scatter(jnp.maximum(h, 0.0))

    @pl.when(jnp.logical_not(is_first_c))
    def _():
        h = jnp.dot(h_scr[pl.ds(row0, TE), :], we_ref[...],
                    preferred_element_type=f32) + be_ref[...]
        _store_message_scatter(jnp.maximum(h, 0.0))

    # ---- end of circle: mean scale (1/deg on the VPU); final circle: readout ---
    @pl.when(is_last_eb)
    def _():
        wprev_scr[...] = wacc_scr[...] * inv_deg_ref[...]

    @pl.when(jnp.logical_and(is_last_eb, is_last_c))
    def _():
        out_ref[...] = jnp.max(wprev_scr[...], axis=0, keepdims=True)


def circle_forward(node_feat, edge_feat, src, dst,
                   wn0, bn0, we0, be0, wn, bn, we, be, *,
                   circles, edge_tile=512):
    f32, bf16 = jnp.float32, jnp.bfloat16

    N, Fn = node_feat.shape
    E, Fe = edge_feat.shape
    H = wn.shape[1]
    HP = _round_up(H, 128)                      # lane-dense hidden dim
    NP = _round_up(N, 8)                        # sublane-friendly node count

    vmem_cap = _vmem_capacity_bytes()

    # --- tiling: fully resident edge structure when it fits, else stream blocks ---
    TE_res = _round_up(max(E, 128), 128)
    if _vmem_footprint(TE_res, TE_res, NP, Fn, Fe, HP) <= int(0.4 * vmem_cap):
        TE, E_pad, n_eb = TE_res, TE_res, 1     # one edge block, all structure resident
    else:
        TE = max(128, _round_up(min(edge_tile, TE_res), 128))
        E_pad = _round_up(E, TE)
        n_eb = E_pad // TE
    # TODO(synk): when (E_pad*HP) bf16 h-state exceeds VMEM (very large E on v7x),
    # stream h through HBM with input_output_aliases instead of a persistent scratch.

    footprint = _vmem_footprint(TE, E_pad, NP, Fn, Fe, HP)
    vmem_limit = int(min(max(32 * 1024 * 1024, 2 * footprint),
                         int(0.85 * vmem_cap)))

    # --- parameters: zero-pad hidden dim; bf16 MXU operands, f32 biases -----------
    def pad2(x, rows, cols):
        return jnp.pad(x, ((0, rows - x.shape[0]), (0, cols - x.shape[1])))

    wn0p = pad2(wn0, Fn, HP).astype(bf16)
    we0p = pad2(we0, Fe, HP).astype(bf16)
    wnp = pad2(wn, HP, HP).astype(bf16)
    wep = pad2(we, HP, HP).astype(bf16)
    bn0p = pad2(bn0, 1, HP).astype(f32)
    be0p = pad2(be0, 1, HP).astype(f32)
    bnp = pad2(bn, 1, HP).astype(f32)
    bep = pad2(be, 1, HP).astype(f32)

    # --- features ------------------------------------------------------------------
    nf = pad2(node_feat, NP, Fn).astype(bf16)
    ef = jnp.pad(edge_feat, ((0, E_pad - E), (0, 0))).astype(bf16)

    # --- graph structure: pure 0/1 one-hots (exact in bf16); 1/deg kept separate ---
    # Padded edges get all-zero gather rows AND all-zero scatter columns, so they
    # contribute nothing regardless of h / bias values.
    src_oh = jnp.pad(jax.nn.one_hot(src, NP, dtype=bf16), ((0, E_pad - E), (0, 0)))
    dst_oh = jax.nn.one_hot(dst, NP, dtype=f32)                         # real edges only
    deg = jnp.sum(dst_oh, axis=0)
    inv_deg = jnp.where(deg > 0, 1.0 / jnp.maximum(deg, 1.0), 0.0).reshape(NP, 1)
    dstT = jnp.pad(dst_oh, ((0, E_pad - E), (0, 0))).T.astype(bf16)     # [NP, E_pad]

    const = lambda c, e: (0, 0)
    if n_eb == 1:
        ef_map = const                      # fully resident: one DMA for all circles
    else:
        # ef is only read at c == 0 -> hold its block index constant for c > 0 so
        # the pipeline skips the dead re-fetches.
        ef_map = lambda c, e: (jnp.where(c == 0, e, 0), 0)

    grid_spec = pltpu.PrefetchScalarGridSpec(
        num_scalar_prefetch=0,
        grid=(circles, n_eb),
        in_specs=[
            pl.BlockSpec((NP, Fn), const),                   # node features (resident)
            pl.BlockSpec((TE, Fe), ef_map),                  # edge features (layer 0 only)
            pl.BlockSpec((TE, NP), lambda c, e: (e, 0)),     # src one-hot
            pl.BlockSpec((NP, TE), lambda c, e: (0, e)),     # dst one-hot^T
            pl.BlockSpec((NP, 1), const),                    # 1 / in-degree
            pl.BlockSpec((Fn, HP), const),                   # Wn0
            pl.BlockSpec((1, HP), const),                    # bn0
            pl.BlockSpec((Fe, HP), const),                   # We0
            pl.BlockSpec((1, HP), const),                    # be0
            pl.BlockSpec((HP, HP), const),                   # Wn (shared)
            pl.BlockSpec((1, HP), const),                    # bn
            pl.BlockSpec((HP, HP), const),                   # We (shared)
            pl.BlockSpec((1, HP), const),                    # be
        ],
        out_specs=pl.BlockSpec((1, HP), const),
        scratch_shapes=[
            pltpu.VMEM((E_pad, HP), bf16),   # per-edge hidden state h (bf16 carry)
            pltpu.VMEM((NP, HP), bf16),      # wk: node linear output (MXU operand)
            pltpu.VMEM((NP, HP), f32),       # w from previous circle
            pltpu.VMEM((NP, HP), f32),       # scatter-sum accumulator
        ],
    )

    flops = circles * (4 * E_pad * NP * HP + 2 * E_pad * HP * HP + 2 * NP * HP * HP)
    struct_passes = 1 if n_eb == 1 else circles          # structure re-streamed only if tiled
    bytes_accessed = (struct_passes * 2 * (2 * E_pad * NP)      # src_oh + dstT (bf16)
                      + E_pad * Fe * 2 + NP * Fn * 2
                      + 2 * HP * HP * 2 + (Fn + Fe) * HP * 2
                      + 4 * HP * 4 + NP * 4 + HP * 4)

    out = pl.pallas_call(
        _circle_kernel,
        out_shape=jax.ShapeDtypeStruct((1, HP), f32),
        grid_spec=grid_spec,
        compiler_params=pltpu.CompilerParams(
            dimension_semantics=("arbitrary", "arbitrary"),
            vmem_limit_bytes=vmem_limit),
        cost_estimate=pl.CostEstimate(flops=flops, transcendentals=0,
                                      bytes_accessed=bytes_accessed),
    )(nf, ef, src_oh, dstT, inv_deg,
      wn0p, bn0p, we0p, be0p, wnp, bnp, wep, bep)

    return out[:, :H]


def circle_reference(node_feat, edge_feat, src, dst,
                     wn0, bn0, we0, be0, wn, bn, we, be, *, circles):
    """Pure-JAX f32 reference mirroring the DGL semantics, for correctness check."""
    N = node_feat.shape[0]
    E = edge_feat.shape[0]

    def agg(w_nodes, h_edges):
        m = w_nodes[src] * h_edges
        s = jax.ops.segment_sum(m, dst, num_segments=N)
        deg = jax.ops.segment_sum(jnp.ones((E,), jnp.float32), dst,
                                  num_segments=N)
        return jnp.where(deg[:, None] > 0,
                         s / jnp.maximum(deg, 1.0)[:, None], 0.0)

    w = jax.nn.relu(node_feat @ wn0 + bn0)
    h = jax.nn.relu(edge_feat @ we0 + be0)
    w = agg(w, h)
    for _ in range(1, circles):
        h = jax.nn.relu(h @ we + be)
        wk = jax.nn.relu(w @ wn + bn)
        w = agg(wk, h)
    return jnp.max(w, axis=0, keepdims=True)


if __name__ == "__main__":
    # Small, deterministic synthetic graph / parameters.
    N, E = 64, 300                # nodes, edges
    NODES_IN, EDGES_IN = 8, 12    # nodes_in_feats, edges_in_feats
    HIDDEN = 32                   # hidden_dim (padded to 128 lanes inside the wrapper)
    CIRCLES = 3

    key = jax.random.PRNGKey(0)
    keys = jax.random.split(key, 12)

    node_feat = jax.random.normal(keys[0], (N, NODES_IN), jnp.float32)   # g.ndata['c']
    edge_feat = jax.random.normal(keys[1], (E, EDGES_IN), jnp.float32)   # g.edata['d']
    src = jax.random.randint(keys[2], (E,), 0, N)
    dst = jax.random.randint(keys[3], (E,), 0, N)

    def xavier(k, fan_in, fan_out):
        std = (2.0 / (fan_in + fan_out)) ** 0.5
        return std * jax.random.normal(k, (fan_in, fan_out), jnp.float32)

    # Layer-0 GraphNN's own nn.Linear params (stored [in, out]).
    wn0 = xavier(keys[4], NODES_IN, HIDDEN)
    bn0 = jax.random.uniform(keys[5], (1, HIDDEN), jnp.float32)
    we0 = xavier(keys[6], EDGES_IN, HIDDEN)
    be0 = jax.random.uniform(keys[7], (1, HIDDEN), jnp.float32)
    # Shared Circle params (self.nweight / self.eweight, xavier_normal; rand biases).
    wn = xavier(keys[8], HIDDEN, HIDDEN)
    bn = jax.random.uniform(keys[9], (1, HIDDEN), jnp.float32)
    we = xavier(keys[10], HIDDEN, HIDDEN)
    be = jax.random.uniform(keys[11], (1, HIDDEN), jnp.float32)

    out = circle_forward(node_feat, edge_feat, src, dst,
                         wn0, bn0, we0, be0, wn, bn, we, be,
                         circles=CIRCLES)
    out = jax.block_until_ready(out)

    ref = circle_reference(node_feat, edge_feat, src, dst,
                           wn0, bn0, we0, be0, wn, bn, we, be, circles=CIRCLES)
    assert out.shape == (1, HIDDEN)
    # bf16 matmul operands (f32 accumulation) -> relaxed tolerance vs the f32 reference.
    assert jnp.allclose(out, ref, rtol=5e-2, atol=5e-2), "mismatch vs reference"

    print("KERNEL_OK")
</pallas_src>

<mosaic_0001>
module attributes {stable_mosaic.version = 11 : i64} {
  func.func @_circle_kernel(%arg0: i32, %arg1: i32, %arg2: memref<64x8xbf16, #tpu.memory_space<vmem>>, %arg3: memref<384x12xbf16, #tpu.memory_space<vmem>>, %arg4: memref<384x64xbf16, #tpu.memory_space<vmem>>, %arg5: memref<64x384xbf16, #tpu.memory_space<vmem>>, %arg6: memref<64x1xf32, #tpu.memory_space<vmem>>, %arg7: memref<8x128xbf16, #tpu.memory_space<vmem>>, %arg8: memref<1x128xf32, #tpu.memory_space<vmem>>, %arg9: memref<12x128xbf16, #tpu.memory_space<vmem>>, %arg10: memref<1x128xf32, #tpu.memory_space<vmem>>, %arg11: memref<128x128xbf16, #tpu.memory_space<vmem>>, %arg12: memref<1x128xf32, #tpu.memory_space<vmem>>, %arg13: memref<128x128xbf16, #tpu.memory_space<vmem>>, %arg14: memref<1x128xf32, #tpu.memory_space<vmem>>, %arg15: memref<1x128xf32, #tpu.memory_space<vmem>>, %arg16: memref<384x128xbf16, #tpu.memory_space<vmem>>, %arg17: memref<64x128xbf16, #tpu.memory_space<vmem>>, %arg18: memref<64x128xf32, #tpu.memory_space<vmem>>, %arg19: memref<64x128xf32, #tpu.memory_space<vmem>>) attributes {dimension_semantics = [#tpu.dimension_semantics<arbitrary>, #tpu.dimension_semantics<arbitrary>], iteration_bounds = array<i64: 3, 1>, scalar_prefetch = 0 : i64, scratch_operands = 4 : i64, tpu.core_type = #tpu.core_type<tc>, window_params = [{pipeline_mode = #tpu.pipeline_mode<synchronous>, transform_indices = @transform_0, window_bounds = array<i64: 64, 8>}, {pipeline_mode = #tpu.pipeline_mode<synchronous>, transform_indices = @transform_1, window_bounds = array<i64: 384, 12>}, {transform_indices = @transform_2, window_bounds = array<i64: 384, 64>}, {transform_indices = @transform_3, window_bounds = array<i64: 64, 384>}, {pipeline_mode = #tpu.pipeline_mode<synchronous>, transform_indices = @transform_4, window_bounds = array<i64: 64, 1>}, {pipeline_mode = #tpu.pipeline_mode<synchronous>, transform_indices = @transform_5, window_bounds = array<i64: 8, 128>}, {pipeline_mode = #tpu.pipeline_mode<synchronous>, transform_indices = @transform_6, window_bounds = array<i64: 1, 128>}, {pipeline_mode = #tpu.pipeline_mode<synchronous>, transform_indices = @transform_7, window_bounds = array<i64: 12, 128>}, {pipeline_mode = #tpu.pipeline_mode<synchronous>, transform_indices = @transform_8, window_bounds = array<i64: 1, 128>}, {pipeline_mode = #tpu.pipeline_mode<synchronous>, transform_indices = @transform_9, window_bounds = array<i64: 128, 128>}, {pipeline_mode = #tpu.pipeline_mode<synchronous>, transform_indices = @transform_10, window_bounds = array<i64: 1, 128>}, {pipeline_mode = #tpu.pipeline_mode<synchronous>, transform_indices = @transform_11, window_bounds = array<i64: 128, 128>}, {pipeline_mode = #tpu.pipeline_mode<synchronous>, transform_indices = @transform_12, window_bounds = array<i64: 1, 128>}, {pipeline_mode = #tpu.pipeline_mode<synchronous>, transform_indices = @transform_13, window_bounds = array<i64: 1, 128>}]} {
    %c0_i32 = arith.constant 0 : i32
    %0 = arith.cmpi eq, %arg1, %c0_i32 : i32
    %c0_i32_0 = arith.constant 0 : i32
    %1 = arith.cmpi eq, %arg1, %c0_i32_0 : i32
    %c0_i32_1 = arith.constant 0 : i32
    %2 = arith.cmpi eq, %arg0, %c0_i32_1 : i32
    %c2_i32 = arith.constant 2 : i32
    %3 = arith.cmpi eq, %arg0, %c2_i32 : i32
    %c384_i32 = arith.constant 384 : i32
    %4 = arith.muli %arg1, %c384_i32 : i32
    %5 = tpu.assume_multiple %4, 384 : i32
    %6 = arith.extui %0 : i1 to i32
    %c0_i32_2 = arith.constant 0 : i32
    %7 = arith.cmpi ne, %6, %c0_i32_2 : i32
    scf.if %7 {
      %cst_13 = arith.constant 0.000000e+00 : f32
      %28 = vector.broadcast %cst_13 : f32 to vector<64x128xf32>
      %c0_14 = arith.constant 0 : index
      %c0_15 = arith.constant 0 : index
      %29 = vector.load %arg19[%c0_14, %c0_15] : memref<64x128xf32, #tpu.memory_space<vmem>>, vector<64x128xf32>
      tpu.vector_store %arg19[%c0_14, %c0_15], %28 {strides = array<i32>} : memref<64x128xf32, #tpu.memory_space<vmem>>, vector<64x128xf32>,
    } else {
    }
    %8 = arith.andi %0, %2 : i1
    %9 = arith.extui %8 : i1 to i32
    %c0_i32_3 = arith.constant 0 : i32
    %10 = arith.cmpi ne, %9, %c0_i32_3 : i32
    scf.if %10 {
      %c0_13 = arith.constant 0 : index
      %c0_14 = arith.constant 0 : index
      %28 = vector.load %arg2[%c0_13, %c0_14] : memref<64x8xbf16, #tpu.memory_space<vmem>>, vector<64x8xbf16>
      %c0_15 = arith.constant 0 : index
      %c0_16 = arith.constant 0 : index
      %29 = vector.load %arg7[%c0_15, %c0_16] : memref<8x128xbf16, #tpu.memory_space<vmem>>, vector<8x128xbf16>
      %cst_17 = arith.constant dense<0.000000e+00> : vector<64x128xf32>
      %30 = tpu.matmul %28, %29, %cst_17 {dimension_numbers = #tpu.dot_dimension_numbers<[1], [0], [0], [1], [0, 0, 1, 1], [], []>} : vector<64x8xbf16>, vector<8x128xbf16>, vector<64x128xf32> -> vector<64x128xf32>
      %c0_18 = arith.constant 0 : index
      %c0_19 = arith.constant 0 : index
      %31 = vector.load %arg8[%c0_18, %c0_19] : memref<1x128xf32, #tpu.memory_space<vmem>>, vector<1x128xf32>
      %32 = vector.broadcast %31 : vector<1x128xf32> to vector<64x128xf32>
      %33 = arith.addf %30, %32 : vector<64x128xf32>
      %cst_20 = arith.constant 0.000000e+00 : f32
      %34 = vector.broadcast %cst_20 : f32 to vector<64x128xf32>
      %35 = arith.maximumf %33, %34 : vector<64x128xf32>
      %36 = arith.truncf %35 : vector<64x128xf32> to vector<64x128xbf16>
      %c0_21 = arith.constant 0 : index
      %c0_22 = arith.constant 0 : index
      %37 = vector.load %arg17[%c0_21, %c0_22] : memref<64x128xbf16, #tpu.memory_space<vmem>>, vector<64x128xbf16>
      tpu.vector_store %arg17[%c0_21, %c0_22], %36 {strides = array<i32>} : memref<64x128xbf16, #tpu.memory_space<vmem>>, vector<64x128xbf16>,
    } else {
    }
    %true = arith.constant true
    %11 = arith.xori %2, %true : i1
    %12 = arith.andi %0, %11 : i1
    %13 = arith.extui %12 : i1 to i32
    %c0_i32_4 = arith.constant 0 : i32
    %14 = arith.cmpi ne, %13, %c0_i32_4 : i32
    scf.if %14 {
      %c0_13 = arith.constant 0 : index
      %c0_14 = arith.constant 0 : index
      %28 = vector.load %arg18[%c0_13, %c0_14] : memref<64x128xf32, #tpu.memory_space<vmem>>, vector<64x128xf32>
      %29 = arith.truncf %28 : vector<64x128xf32> to vector<64x128xbf16>
      %c0_15 = arith.constant 0 : index
      %c0_16 = arith.constant 0 : index
      %30 = vector.load %arg11[%c0_15, %c0_16] : memref<128x128xbf16, #tpu.memory_space<vmem>>, vector<128x128xbf16>
      %cst_17 = arith.constant dense<0.000000e+00> : vector<64x128xf32>
      %31 = tpu.matmul %29, %30, %cst_17 {dimension_numbers = #tpu.dot_dimension_numbers<[1], [0], [0], [1], [0, 0, 1, 1], [], []>} : vector<64x128xbf16>, vector<128x128xbf16>, vector<64x128xf32> -> vector<64x128xf32>
      %c0_18 = arith.constant 0 : index
      %c0_19 = arith.constant 0 : index
      %32 = vector.load %arg12[%c0_18, %c0_19] : memref<1x128xf32, #tpu.memory_space<vmem>>, vector<1x128xf32>
      %33 = vector.broadcast %32 : vector<1x128xf32> to vector<64x128xf32>
      %34 = arith.addf %31, %33 : vector<64x128xf32>
      %cst_20 = arith.constant 0.000000e+00 : f32
      %35 = vector.broadcast %cst_20 : f32 to vector<64x128xf32>
      %36 = arith.maximumf %34, %35 : vector<64x128xf32>
      %37 = arith.truncf %36 : vector<64x128xf32> to vector<64x128xbf16>
      %c0_21 = arith.constant 0 : index
      %c0_22 = arith.constant 0 : index
      %38 = vector.load %arg17[%c0_21, %c0_22] : memref<64x128xbf16, #tpu.memory_space<vmem>>, vector<64x128xbf16>
      tpu.vector_store %arg17[%c0_21, %c0_22], %37 {strides = array<i32>} : memref<64x128xbf16, #tpu.memory_space<vmem>>, vector<64x128xbf16>,
    } else {
    }
    %c0 = arith.constant 0 : index
    %c0_5 = arith.constant 0 : index
    %15 = vector.load %arg4[%c0, %c0_5] : memref<384x64xbf16, #tpu.memory_space<vmem>>, vector<384x64xbf16>
    %c0_6 = arith.constant 0 : index
    %c0_7 = arith.constant 0 : index
    %16 = vector.load %arg17[%c0_6, %c0_7] : memref<64x128xbf16, #tpu.memory_space<vmem>>, vector<64x128xbf16>
    %cst = arith.constant dense<0.000000e+00> : vector<384x128xf32>
    %17 = tpu.matmul %15, %16, %cst {dimension_numbers = #tpu.dot_dimension_numbers<[1], [0], [0], [1], [0, 0, 1, 1], [], []>} : vector<384x64xbf16>, vector<64x128xbf16>, vector<384x128xf32> -> vector<384x128xf32>
    %18 = arith.extui %2 : i1 to i32
    %c0_i32_8 = arith.constant 0 : i32
    %19 = arith.cmpi ne, %18, %c0_i32_8 : i32
    scf.if %19 {
      %c0_13 = arith.constant 0 : index
      %c0_14 = arith.constant 0 : index
      %28 = vector.load %arg3[%c0_13, %c0_14] : memref<384x12xbf16, #tpu.memory_space<vmem>>, vector<384x12xbf16>
      %c0_15 = arith.constant 0 : index
      %c0_16 = arith.constant 0 : index
      %29 = vector.load %arg9[%c0_15, %c0_16] : memref<12x128xbf16, #tpu.memory_space<vmem>>, vector<12x128xbf16>
      %cst_17 = arith.constant dense<0.000000e+00> : vector<384x128xf32>
      %30 = tpu.matmul %28, %29, %cst_17 {dimension_numbers = #tpu.dot_dimension_numbers<[1], [0], [0], [1], [0, 0, 1, 1], [], []>} : vector<384x12xbf16>, vector<12x128xbf16>, vector<384x128xf32> -> vector<384x128xf32>
      %c0_18 = arith.constant 0 : index
      %c0_19 = arith.constant 0 : index
      %31 = vector.load %arg10[%c0_18, %c0_19] : memref<1x128xf32, #tpu.memory_space<vmem>>, vector<1x128xf32>
      %32 = vector.broadcast %31 : vector<1x128xf32> to vector<384x128xf32>
      %33 = arith.addf %30, %32 : vector<384x128xf32>
      %cst_20 = arith.constant 0.000000e+00 : f32
      %34 = vector.broadcast %cst_20 : f32 to vector<384x128xf32>
      %35 = arith.maximumf %33, %34 : vector<384x128xf32>
      %36 = arith.truncf %35 : vector<384x128xf32> to vector<384x128xbf16>
      %37 = arith.index_cast %5 : i32 to index
      %c0_21 = arith.constant 0 : index
      %38 = vector.load %arg16[%37, %c0_21] : memref<384x128xbf16, #tpu.memory_space<vmem>>, vector<384x128xbf16>
      tpu.vector_store %arg16[%37, %c0_21], %36 {strides = array<i32>} : memref<384x128xbf16, #tpu.memory_space<vmem>>, vector<384x128xbf16>,
      %39 = arith.mulf %17, %35 : vector<384x128xf32>
      %40 = arith.truncf %39 : vector<384x128xf32> to vector<384x128xbf16>
      %c0_22 = arith.constant 0 : index
      %c0_23 = arith.constant 0 : index
      %41 = vector.load %arg19[%c0_22, %c0_23] : memref<64x128xf32, #tpu.memory_space<vmem>>, vector<64x128xf32>
      %c0_24 = arith.constant 0 : index
      %c0_25 = arith.constant 0 : index
      %42 = vector.load %arg5[%c0_24, %c0_25] : memref<64x384xbf16, #tpu.memory_space<vmem>>, vector<64x384xbf16>
      %cst_26 = arith.constant dense<0.000000e+00> : vector<64x128xf32>
      %43 = tpu.matmul %42, %40, %cst_26 {dimension_numbers = #tpu.dot_dimension_numbers<[1], [0], [0], [1], [0, 0, 1, 1], [], []>} : vector<64x384xbf16>, vector<384x128xbf16>, vector<64x128xf32> -> vector<64x128xf32>
      %44 = arith.addf %41, %43 : vector<64x128xf32>
      %c0_27 = arith.constant 0 : index
      %c0_28 = arith.constant 0 : index
      %45 = vector.load %arg19[%c0_27, %c0_28] : memref<64x128xf32, #tpu.memory_space<vmem>>, vector<64x128xf32>
      tpu.vector_store %arg19[%c0_27, %c0_28], %44 {strides = array<i32>} : memref<64x128xf32, #tpu.memory_space<vmem>>, vector<64x128xf32>,
    } else {
    }
    %true_9 = arith.constant true
    %20 = arith.xori %2, %true_9 : i1
    %21 = arith.extui %20 : i1 to i32
    %c0_i32_10 = arith.constant 0 : i32
    %22 = arith.cmpi ne, %21, %c0_i32_10 : i32
    scf.if %22 {
      %28 = arith.index_cast %5 : i32 to index
      %c0_13 = arith.constant 0 : index
      %29 = vector.load %arg16[%28, %c0_13] : memref<384x128xbf16, #tpu.memory_space<vmem>>, vector<384x128xbf16>
      %c0_14 = arith.constant 0 : index
      %c0_15 = arith.constant 0 : index
      %30 = vector.load %arg13[%c0_14, %c0_15] : memref<128x128xbf16, #tpu.memory_space<vmem>>, vector<128x128xbf16>
      %cst_16 = arith.constant dense<0.000000e+00> : vector<384x128xf32>
      %31 = tpu.matmul %29, %30, %cst_16 {dimension_numbers = #tpu.dot_dimension_numbers<[1], [0], [0], [1], [0, 0, 1, 1], [], []>} : vector<384x128xbf16>, vector<128x128xbf16>, vector<384x128xf32> -> vector<384x128xf32>
      %c0_17 = arith.constant 0 : index
      %c0_18 = arith.constant 0 : index
      %32 = vector.load %arg14[%c0_17, %c0_18] : memref<1x128xf32, #tpu.memory_space<vmem>>, vector<1x128xf32>
      %33 = vector.broadcast %32 : vector<1x128xf32> to vector<384x128xf32>
      %34 = arith.addf %31, %33 : vector<384x128xf32>
      %cst_19 = arith.constant 0.000000e+00 : f32
      %35 = vector.broadcast %cst_19 : f32 to vector<384x128xf32>
      %36 = arith.maximumf %34, %35 : vector<384x128xf32>
      %37 = arith.truncf %36 : vector<384x128xf32> to vector<384x128xbf16>
      %38 = arith.index_cast %5 : i32 to index
      %c0_20 = arith.constant 0 : index
      %39 = vector.load %arg16[%38, %c0_20] : memref<384x128xbf16, #tpu.memory_space<vmem>>, vector<384x128xbf16>
      tpu.vector_store %arg16[%38, %c0_20], %37 {strides = array<i32>} : memref<384x128xbf16, #tpu.memory_space<vmem>>, vector<384x128xbf16>,
      %40 = arith.mulf %17, %36 : vector<384x128xf32>
      %41 = arith.truncf %40 : vector<384x128xf32> to vector<384x128xbf16>
      %c0_21 = arith.constant 0 : index
      %c0_22 = arith.constant 0 : index
      %42 = vector.load %arg19[%c0_21, %c0_22] : memref<64x128xf32, #tpu.memory_space<vmem>>, vector<64x128xf32>
      %c0_23 = arith.constant 0 : index
      %c0_24 = arith.constant 0 : index
      %43 = vector.load %arg5[%c0_23, %c0_24] : memref<64x384xbf16, #tpu.memory_space<vmem>>, vector<64x384xbf16>
      %cst_25 = arith.constant dense<0.000000e+00> : vector<64x128xf32>
      %44 = tpu.matmul %43, %41, %cst_25 {dimension_numbers = #tpu.dot_dimension_numbers<[1], [0], [0], [1], [0, 0, 1, 1], [], []>} : vector<64x384xbf16>, vector<384x128xbf16>, vector<64x128xf32> -> vector<64x128xf32>
      %45 = arith.addf %42, %44 : vector<64x128xf32>
      %c0_26 = arith.constant 0 : index
      %c0_27 = arith.constant 0 : index
      %46 = vector.load %arg19[%c0_26, %c0_27] : memref<64x128xf32, #tpu.memory_space<vmem>>, vector<64x128xf32>
      tpu.vector_store %arg19[%c0_26, %c0_27], %45 {strides = array<i32>} : memref<64x128xf32, #tpu.memory_space<vmem>>, vector<64x128xf32>,
    } else {
    }
    %23 = arith.extui %1 : i1 to i32
    %c0_i32_11 = arith.constant 0 : i32
    %24 = arith.cmpi ne, %23, %c0_i32_11 : i32
    scf.if %24 {
      %c0_13 = arith.constant 0 : index
      %c0_14 = arith.constant 0 : index
      %28 = vector.load %arg19[%c0_13, %c0_14] : memref<64x128xf32, #tpu.memory_space<vmem>>, vector<64x128xf32>
      %c0_15 = arith.constant 0 : index
      %c0_16 = arith.constant 0 : index
      %29 = vector.load %arg6[%c0_15, %c0_16] : memref<64x1xf32, #tpu.memory_space<vmem>>, vector<64x1xf32>
      %30 = vector.broadcast %29 : vector<64x1xf32> to vector<64x128xf32>
      %31 = arith.mulf %28, %30 : vector<64x128xf32>
      %c0_17 = arith.constant 0 : index
      %c0_18 = arith.constant 0 : index
      %32 = vector.load %arg18[%c0_17, %c0_18] : memref<64x128xf32, #tpu.memory_space<vmem>>, vector<64x128xf32>
      tpu.vector_store %arg18[%c0_17, %c0_18], %31 {strides = array<i32>} : memref<64x128xf32, #tpu.memory_space<vmem>>, vector<64x128xf32>,
    } else {
    }
    %25 = arith.andi %1, %3 : i1
    %26 = arith.extui %25 : i1 to i32
    %c0_i32_12 = arith.constant 0 : i32
    %27 = arith.cmpi ne, %26, %c0_i32_12 : i32
    scf.if %27 {
      %c0_13 = arith.constant 0 : index
      %c0_14 = arith.constant 0 : index
      %28 = vector.load %arg18[%c0_13, %c0_14] : memref<64x128xf32, #tpu.memory_space<vmem>>, vector<64x128xf32>
      %cst_15 = arith.constant dense<0xFF800000> : vector<128xf32>
      %29 = vector.multi_reduction <maximumf>, %28, %cst_15 [0] : vector<64x128xf32> to vector<128xf32>
      %30 = vector.shape_cast %29 : vector<128xf32> to vector<1x128xf32>
      %c0_16 = arith.constant 0 : index
      %c0_17 = arith.constant 0 : index
      %31 = vector.load %arg15[%c0_16, %c0_17] : memref<1x128xf32, #tpu.memory_space<vmem>>, vector<1x128xf32>
      tpu.vector_store %arg15[%c0_16, %c0_17], %30 {strides = array<i32>} : memref<1x128xf32, #tpu.memory_space<vmem>>, vector<1x128xf32>,
    } else {
    }
    return
  }
  func.func @transform_0(%arg0: i32, %arg1: i32) -> (i32, i32) {
    %c0_i32 = arith.constant 0 : i32
    %c0_i32_0 = arith.constant 0 : i32
    %c0_i32_1 = arith.constant 0 : i32
    return %c0_i32, %c0_i32_0 : i32, i32
  }
  func.func @transform_1(%arg0: i32, %arg1: i32) -> (i32, i32) {
    %c0_i32 = arith.constant 0 : i32
    %c0_i32_0 = arith.constant 0 : i32
    %c0_i32_1 = arith.constant 0 : i32
    return %c0_i32, %c0_i32_0 : i32, i32
  }
  func.func @transform_2(%arg0: i32, %arg1: i32) -> (i32, i32) {
    %c0_i32 = arith.constant 0 : i32
    %c0_i32_0 = arith.constant 0 : i32
    return %arg1, %c0_i32 : i32, i32
  }
  func.func @transform_3(%arg0: i32, %arg1: i32) -> (i32, i32) {
    %c0_i32 = arith.constant 0 : i32
    %c0_i32_0 = arith.constant 0 : i32
    return %c0_i32, %arg1 : i32, i32
  }
  func.func @transform_4(%arg0: i32, %arg1: i32) -> (i32, i32) {
    %c0_i32 = arith.constant 0 : i32
    %c0_i32_0 = arith.constant 0 : i32
    %c0_i32_1 = arith.constant 0 : i32
    return %c0_i32, %c0_i32_0 : i32, i32
  }
  func.func @transform_5(%arg0: i32, %arg1: i32) -> (i32, i32) {
    %c0_i32 = arith.constant 0 : i32
    %c0_i32_0 = arith.constant 0 : i32
    %c0_i32_1 = arith.constant 0 : i32
    return %c0_i32, %c0_i32_0 : i32, i32
  }
  func.func @transform_6(%arg0: i32, %arg1: i32) -> (i32, i32) {
    %c0_i32 = arith.constant 0 : i32
    %c0_i32_0 = arith.constant 0 : i32
    %c0_i32_1 = arith.constant 0 : i32
    return %c0_i32, %c0_i32_0 : i32, i32
  }
  func.func @transform_7(%arg0: i32, %arg1: i32) -> (i32, i32) {
    %c0_i32 = arith.constant 0 : i32
    %c0_i32_0 = arith.constant 0 : i32
    %c0_i32_1 = arith.constant 0 : i32
    return %c0_i32, %c0_i32_0 : i32, i32
  }
  func.func @transform_8(%arg0: i32, %arg1: i32) -> (i32, i32) {
    %c0_i32 = arith.constant 0 : i32
    %c0_i32_0 = arith.constant 0 : i32
    %c0_i32_1 = arith.constant 0 : i32
    return %c0_i32, %c0_i32_0 : i32, i32
  }
  func.func @transform_9(%arg0: i32, %arg1: i32) -> (i32, i32) {
    %c0_i32 = arith.constant 0 : i32
    %c0_i32_0 = arith.constant 0 : i32
    %c0_i32_1 = arith.constant 0 : i32
    return %c0_i32, %c0_i32_0 : i32, i32
  }
  func.func @transform_10(%arg0: i32, %arg1: i32) -> (i32, i32) {
    %c0_i32 = arith.constant 0 : i32
    %c0_i32_0 = arith.constant 0 : i32
    %c0_i32_1 = arith.constant 0 : i32
    return %c0_i32, %c0_i32_0 : i32, i32
  }
  func.func @transform_11(%arg0: i32, %arg1: i32) -> (i32, i32) {
    %c0_i32 = arith.constant 0 : i32
    %c0_i32_0 = arith.constant 0 : i32
    %c0_i32_1 = arith.constant 0 : i32
    return %c0_i32, %c0_i32_0 : i32, i32
  }
  func.func @transform_12(%arg0: i32, %arg1: i32) -> (i32, i32) {
    %c0_i32 = arith.constant 0 : i32
    %c0_i32_0 = arith.constant 0 : i32
    %c0_i32_1 = arith.constant 0 : i32
    return %c0_i32, %c0_i32_0 : i32, i32
  }
  func.func @transform_13(%arg0: i32, %arg1: i32) -> (i32, i32) {
    %c0_i32 = arith.constant 0 : i32
    %c0_i32_0 = arith.constant 0 : i32
    %c0_i32_1 = arith.constant 0 : i32
    return %c0_i32, %c0_i32_0 : i32, i32
  }
}

</mosaic_0001>

<bundles_post_ra>
// kernel: tpu_custom_call.1
= control target key start
LH: loop header
LB: loop body
LE: loop exit
PB: predicated region body
PF: predicated region fallthrough
CT: control target
= control target key end

     0   :  { %18 = vsyncpa [#allocation7], 0  ;;  %s4149_s25 = smov 0   ;;  %s4151_s26 = smov 0   ;;  %s5238_s0 = inlined_call_operand.vmem [shape: bf16[64,8], index: 0, kind: input, shape index: {}]   ;;  %s5239_s1 = inlined_call_operand.vmem [shape: bf16[384,12], index: 1, kind: input, shape index: {}]   ;;  %s5240_s2 = inlined_call_operand.vmem [shape: bf16[384,64], index: 2, kind: input, shape index: {}]   ;;  %s5241_s3 = inlined_call_operand.vmem [shape: bf16[64,384], index: 3, kind: input, shape index: {}]   ;;  %s5242_s4 = inlined_call_operand.vmem [shape: f32[64,1], index: 4, kind: input, shape index: {}]   ;;  %s5243_s5 = inlined_call_operand.vmem [shape: bf16[8,128], index: 5, kind: input, shape index: {}]   ;;  %s5244_s6 = inlined_call_operand.vmem [shape: f32[1,128], index: 6, kind: input, shape index: {}]   ;;  %s5245_s7 = inlined_call_operand.vmem [shape: bf16[12,128], index: 7, kind: input, shape index: {}]   ;;  %s5246_s8 = inlined_call_operand.vmem [shape: f32[1,128], index: 8, kind: input, shape index: {}]   ;;  %s5247_s9 = inlined_call_operand.vmem [shape: bf16[128,128], index: 9, kind: input, shape index: {}]   ;;  %s5248_s10 = inlined_call_operand.vmem [shape: f32[1,128], index: 10, kind: input, shape index: {}]   ;;  %s5249_s11 = inlined_call_operand.vmem [shape: bf16[128,128], index: 11, kind: input, shape index: {}]   ;;  %s5250_s12 = inlined_call_operand.vmem [shape: f32[1,128], index: 12, kind: input, shape index: {}]   ;;  %s5251_s13 = inlined_call_operand.hbm [shape: f32[1,128], index: 13, kind: output, shape index: {}]  }
   0x1   :  { %s4153_s27 = smov 0  }
   0x2 LB: > { %s2908_s28 = sadd.s32 4294967295, %s4074_s27   ;;  %s36_s29 = sadd.s32 1, %s4070_s26  ;;  %s4074_s27 = sphi %s4153_s27, %s24_s27   ;;  %s4070_s26 = sphi %s4151_s26, %s5415_s26   ;;  %s4066_s25 = sphi %s4149_s25, %s5414_s25  }
   0x3   : > { %p38_p0 = scmp.ge.s32.totalorder %s36_s29, 3  ;;  %p2912_p1 = scmp.ge.s32.totalorder %s4074_s27, 1 }
   0x4   : > { %p407_p2 = scmp.lt.s32.totalorder %s4074_s27, 4 }
   0x5   : > { %s5417_s29 = smov (%p38_p0, %s36_s29), 0 }
   0x6   : > { %p408_p3 = pnand %p2912_p1, %p407_p2 }
   0x8   : > { %411 = sbr.rel (%p408_p3) target bundleno = 1769 (0x6e9), region = 72 }
   0xd   : > { %p465_p4 = scmp.eq.s32.totalorder %s4066_s25, 0  ;;  %p466_p5 = scmp.eq.s32.totalorder %s4066_s25, 2  ;;  %v4076_v0 = vmov 0.0  }
   0xe   : > { %471 = vst [vmem:[#allocation5 + $0x38] sm:$0xff] %v4076_v0  ;;  %v491_v1 = vld [vmem:[%s5243_s5] sm:$0xf] (%p465_p4)  ;;  %vm529_vm0 = vcmask (%p465_p4), 1043456   ;;  %v3460_v4 = vld [vmem:[%s5238_s0 + $0x8] sm:$0xff] (%p465_p4)  ;;  %vm516_vm1 = vcmask (%p465_p4), 64512  }
   0xf   : > { %472 = vst [vmem:[#allocation5 + $0x20] sm:$0xff] %v4076_v0  ;;  %v531_v2 = vsel (%p465_p4), %vm529_vm0, %v491_v1, 0  ;;  %v3459_v3 = vld [vmem:[%s5238_s0] sm:$0xff] (%p465_p4)  ;;  %v3461_v5 = vld [vmem:[%s5238_s0 + $0x10] sm:$0xff] (%p465_p4)  ;;  %v3462_v6 = vld [vmem:[%s5238_s0 + $0x18] sm:$0xff] (%p465_p4) }
  0x10   : > { %473 = vst [vmem:[#allocation5 + $0x30] sm:$0xff] %v4076_v0  ;;  %540 = vmatpush.bf16.msra.mxu0 (%p465_p4), %v531_v2  ;;  %3914 = vmatpush.bf16.msra.mxu1 (%p465_p4), %v531_v2  ;;  %v4013_v9 = vld [vmem:[%s5244_s6] ss:$0 sm:$0xff] (%p465_p4) }
  0x11   : > { %474 = vst [vmem:[#allocation5 + $0x28] sm:$0xff] %v4076_v0  ;;  %482 = sbr.rel (!%p465_p4) target bundleno = 168 (0xa8), region = 80  ;;  %3915 = vmatpush.bf16.msra.mxu2 (%p465_p4), %v531_v2  ;;  %3916 = vmatpush.bf16.msra.mxu3 (%p465_p4), %v531_v2 }
  0x12   : > { %475 = vst [vmem:[#allocation5] sm:$0xff] %v4076_v0 }
  0x13   : > { %476 = vst [vmem:[#allocation5 + $0x18] sm:$0xff] %v4076_v0  ;;  %2930 = vmatmul.msk.bf16.vlgmr.msra.gmra.mxu0 (%p465_p4), %vm516_vm1, %v3459_v3  ;;  %2931 = vmatmul.msk.bf16.vlgmr.msra.gmra.mxu1 (%p465_p4), %vm516_vm1, %v3460_v4 }
  0x14   : > { %477 = vst [vmem:[#allocation5 + $0x10] sm:$0xff] %v4076_v0  ;;  %2932 = vmatmul.msk.bf16.vlgmr.msra.gmra.mxu2 (%p465_p4), %vm516_vm1, %v3461_v5  ;;  %2933 = vmatmul.msk.bf16.vlgmr.msra.gmra.mxu3 (%p465_p4), %vm516_vm1, %v3462_v6 }
  0x15   : > { %478 = vst [vmem:[#allocation5 + $0x8] sm:$0xff] %v4076_v0 }
  0x90   : > { %v542_v7 = vpop.f32.mrf.mxu0  ;;  %v547_v8 = vpop.f32.mrf.mxu1 }
  0x91   : > { %v543_v10 = vadd.f32 %v4013_v9, %v542_v7  ;;  %v548_v11 = vadd.f32 %v4013_v9, %v547_v8 }
  0x93   : > { %v562_v18 = vmax.f32 %v543_v10, 0.0  ;;  %v564_v19 = vmax.f32 %v548_v11, 0.0 }
  0x97   : > { %v552_v12 = vpop.f32.mrf.mxu2  ;;  %v557_v13 = vpop.f32.mrf.mxu3 }
  0x98   : > { %v544_v14 = vpop.f32.mrf.mxu0  ;;  %v549_v15 = vpop.f32.mrf.mxu1  ;;  %v553_v24 = vadd.f32 %v4013_v9, %v552_v12  ;;  %v558_v25 = vadd.f32 %v4013_v9, %v557_v13 }
  0x99   : > { %v545_v16 = vadd.f32 %v4013_v9, %v544_v14  ;;  %v550_v17 = vadd.f32 %v4013_v9, %v549_v15 }
  0x9a   : > { %v566_v30 = vmax.f32 %v553_v24, 0.0  ;;  %v568_v31 = vmax.f32 %v558_v25, 0.0 }
  0x9b   : > { %v563_v20 = vmax.f32 %v545_v16, 0.0  ;;  %v565_v21 = vmax.f32 %v550_v17, 0.0 }
  0x9d   : > { %v3585_v22 = vpack.c.bf16 %v563_v20, %v562_v18  ;;  %v3590_v23 = vpack.c.bf16 %v565_v21, %v564_v19 }
  0x9f   : > { %3586 = vst [vmem:[#allocation3 + $0x10] sm:$0xff] %v3585_v22   ;;  %v554_v26 = vpop.f32.mrf.mxu2  ;;  %v559_v27 = vpop.f32.mrf.mxu3 }
  0xa0   : > { %3862 = vst [vmem:[#allocation3 + $0x8] sm:$0xff] %v3590_v23   ;;  %v555_v28 = vadd.f32 %v4013_v9, %v554_v26  ;;  %v560_v29 = vadd.f32 %v4013_v9, %v559_v27 }
  0xa2   : > { %v567_v32 = vmax.f32 %v555_v28, 0.0  ;;  %v569_v33 = vmax.f32 %v560_v29, 0.0 }
  0xa4   : > { %v3595_v34 = vpack.c.bf16 %v567_v32, %v566_v30  ;;  %v3600_v35 = vpack.c.bf16 %v569_v33, %v568_v31 }
  0xa6   : > { %3863 = vst [vmem:[#allocation3] sm:$0xff] %v3595_v34  }
  0xa7   : > { %3864 = vst [vmem:[#allocation3 + $0x18] sm:$0xff] %v3600_v35  }
  0xa8 PF: > { %p586_p6 = scmp.ne.s32.totalorder %s4066_s25, 0 }
  0xa9   : > { %v3471_v36 = vld [vmem:[%s5247_s9 + $0x38] sm:$0xff] (%p586_p6)  ;;  %v3470_v37 = vld [vmem:[%s5247_s9 + $0x30] sm:$0xff] (%p586_p6)  ;;  %v3469_v38 = vld [vmem:[%s5247_s9 + $0x28] sm:$0xff] (%p586_p6) }
  0xaa   : > { %590 = sbr.rel (!%p586_p6) target bundleno = 350 (0x15e), region = 84  ;;  %671 = vmatpush.bf16.msra.mxu0 (%p586_p6), %v3471_v36  ;;  %3917 = vmatpush.bf16.msra.mxu1 (%p586_p6), %v3471_v36  ;;  %v3468_v39 = vld [vmem:[%s5247_s9 + $0x20] sm:$0xff] (%p586_p6)  ;;  %v3467_v40 = vld [vmem:[%s5247_s9 + $0x18] sm:$0xff] (%p586_p6)  ;;  %v3466_v41 = vld [vmem:[%s5247_s9 + $0x10] sm:$0xff] (%p586_p6) }
  0xab   : > { %3918 = vmatpush.bf16.msra.mxu2 (%p586_p6), %v3471_v36  ;;  %3919 = vmatpush.bf16.msra.mxu3 (%p586_p6), %v3471_v36  ;;  %v3465_v42 = vld [vmem:[%s5247_s9 + $0x8] sm:$0xff] (%p586_p6)  ;;  %v3464_v43 = vld [vmem:[%s5247_s9] sm:$0xff] (%p586_p6)  ;;  %v591_v44 = vld [vmem:[#allocation4 + $0x18] sm:$0xff] (%p586_p6) }
  0xac   : > { %v592_v45 = vld [vmem:[#allocation4 + $0x8] sm:$0xff] (%p586_p6)  ;;  %v593_v46 = vld [vmem:[#allocation4 + $0x20] sm:$0xff] (%p586_p6)  ;;  %v594_v47 = vld [vmem:[#allocation4 + $0x10] sm:$0xff] (%p586_p6) }
  0xad   : > { %v595_v48 = vld [vmem:[#allocation4] sm:$0xff] (%p586_p6)  ;;  %v596_v49 = vld [vmem:[#allocation4 + $0x30] sm:$0xff] (%p586_p6)  ;;  %v597_v50 = vld [vmem:[#allocation4 + $0x38] sm:$0xff] (%p586_p6)  ;;  %v599_v52 = vpack.c.bf16 (%p586_p6), %v592_v45, %v591_v44  ;;  %v600_v53 = vpack.c.bf16 (%p586_p6), %v594_v47, %v593_v46 }
  0xae   : > { %672 = vmatpush.bf16.msra.mxu0 (%p586_p6), %v3470_v37  ;;  %3920 = vmatpush.bf16.msra.mxu1 (%p586_p6), %v3470_v37  ;;  %v598_v51 = vld [vmem:[#allocation4 + $0x28] sm:$0xff] (%p586_p6)  ;;  %v601_v54 = vpack.c.bf16 (%p586_p6), %v596_v49, %v595_v48  ;;  %v4014_v58 = vld [vmem:[%s5248_s10] ss:$0 sm:$0xff] (%p586_p6) }
  0xaf   : > { %3921 = vmatpush.bf16.msra.mxu2 %v3470_v37  ;;  %3922 = vmatpush.bf16.msra.mxu3 %v3470_v37  ;;  %v602_v55 = vpack.c.bf16 %v598_v51, %v597_v50 }
  0xb2   : > { %673 = vmatpush.bf16.msra.mxu0 %v3469_v38  ;;  %3923 = vmatpush.bf16.msra.mxu1 %v3469_v38 }
  0xb3   : > { %3924 = vmatpush.bf16.msra.mxu2 %v3469_v38  ;;  %3925 = vmatpush.bf16.msra.mxu3 %v3469_v38 }
  0xb6   : > { %674 = vmatpush.bf16.msra.mxu0 %v3468_v39  ;;  %3926 = vmatpush.bf16.msra.mxu1 %v3468_v39 }
  0xb7   : > { %3927 = vmatpush.bf16.msra.mxu2 %v3468_v39  ;;  %3928 = vmatpush.bf16.msra.mxu3 %v3468_v39 }
  0xba   : > { %675 = vmatpush.bf16.msra.mxu0 %v3467_v40  ;;  %3929 = vmatpush.bf16.msra.mxu1 %v3467_v40 }
  0xbb   : > { %3930 = vmatpush.bf16.msra.mxu2 %v3467_v40  ;;  %3931 = vmatpush.bf16.msra.mxu3 %v3467_v40 }
  0xbe   : > { %676 = vmatpush.bf16.msra.mxu0 %v3466_v41  ;;  %3932 = vmatpush.bf16.msra.mxu1 %v3466_v41 }
  0xbf   : > { %3933 = vmatpush.bf16.msra.mxu2 %v3466_v41  ;;  %3934 = vmatpush.bf16.msra.mxu3 %v3466_v41 }
  0xc2   : > { %677 = vmatpush.bf16.msra.mxu0 %v3465_v42  ;;  %3935 = vmatpush.bf16.msra.mxu1 %v3465_v42 }
  0xc3   : > { %3936 = vmatpush.bf16.msra.mxu2 %v3465_v42  ;;  %3937 = vmatpush.bf16.msra.mxu3 %v3465_v42 }
  0xc6   : > { %678 = vmatpush.bf16.msra.mxu0 %v3464_v43  ;;  %3938 = vmatpush.bf16.msra.mxu1 %v3464_v43 }
  0xc7   : > { %3939 = vmatpush.bf16.msra.mxu2 %v3464_v43  ;;  %3940 = vmatpush.bf16.msra.mxu3 %v3464_v43 }
  0xc9   : > { %679 = vmatmul.bf16.vlgmr.msra.gmra.mxu0 %v599_v52  ;;  %684 = vmatmul.bf16.vlgmr.msra.gmra.mxu1 %v600_v53 }
  0xca   : > { %689 = vmatmul.bf16.vlgmr.msra.gmra.mxu2 %v601_v54  ;;  %694 = vmatmul.bf16.vlgmr.msra.gmra.mxu3 %v602_v55 }
 0x146   : > { %v680_v56 = vpop.f32.mrf.mxu0  ;;  %v685_v57 = vpop.f32.mrf.mxu1 }
 0x147   : > { %v681_v59 = vadd.f32 %v4014_v58, %v680_v56  ;;  %v686_v60 = vadd.f32 %v4014_v58, %v685_v57 }
 0x149   : > { %v700_v3 = vmax.f32 %v681_v59, 0.0  ;;  %v702_v4 = vmax.f32 %v686_v60, 0.0 }
 0x14d   : > { %v690_v61 = vpop.f32.mrf.mxu2  ;;  %v695_v62 = vpop.f32.mrf.mxu3 }
 0x14e   : > { %v682_v63 = vpop.f32.mrf.mxu0  ;;  %v687_v0 = vpop.f32.mrf.mxu1  ;;  %v691_v9 = vadd.f32 %v4014_v58, %v690_v61  ;;  %v696_v10 = vadd.f32 %v4014_v58, %v695_v62 }
 0x14f   : > { %v683_v1 = vadd.f32 %v4014_v58, %v682_v63  ;;  %v688_v2 = vadd.f32 %v4014_v58, %v687_v0 }
 0x150   : > { %v704_v15 = vmax.f32 %v691_v9, 0.0  ;;  %v706_v16 = vmax.f32 %v696_v10, 0.0 }
 0x151   : > { %v701_v5 = vmax.f32 %v683_v1, 0.0  ;;  %v703_v6 = vmax.f32 %v688_v2, 0.0 }
 0x153   : > { %v3605_v7 = vpack.c.bf16 %v701_v5, %v700_v3  ;;  %v3610_v8 = vpack.c.bf16 %v703_v6, %v702_v4 }
 0x155   : > { %3606 = vst [vmem:[#allocation3 + $0x10] sm:$0xff] %v3605_v7   ;;  %v692_v11 = vpop.f32.mrf.mxu2  ;;  %v697_v12 = vpop.f32.mrf.mxu3 }
 0x156   : > { %3865 = vst [vmem:[#allocation3 + $0x8] sm:$0xff] %v3610_v8   ;;  %v693_v13 = vadd.f32 %v4014_v58, %v692_v11  ;;  %v698_v14 = vadd.f32 %v4014_v58, %v697_v12 }
 0x158   : > { %v705_v17 = vmax.f32 %v693_v13, 0.0  ;;  %v707_v18 = vmax.f32 %v698_v14, 0.0 }
 0x15a   : > { %v3615_v19 = vpack.c.bf16 %v705_v17, %v704_v15  ;;  %v3620_v20 = vpack.c.bf16 %v707_v18, %v706_v16 }
 0x15c   : > { %3866 = vst [vmem:[#allocation3] sm:$0xff] %v3615_v19  }
 0x15d   : > { %3867 = vst [vmem:[#allocation3 + $0x18] sm:$0xff] %v3620_v20  }
 0x15e PF: > { %v3497_v23 = vld [vmem:[#allocation3 + $0x8] sm:$0xff]  ;;  %v3496_v24 = vld [vmem:[#allocation3 + $0x10] sm:$0xff]  ;;  %v3472_v25 = vld [vmem:[%s5240_s2] sm:$0xff]  ;;  %vm924_vm2 = vcmask 523264  }
 0x15f   : > { %v3478_v26 = vld [vmem:[%s5240_s2 + $0x30] sm:$0xff]  ;;  %v3484_v27 = vld [vmem:[%s5240_s2 + $0x60] sm:$0xff]  ;;  %v3473_v29 = vld [vmem:[%s5240_s2 + $0x8] sm:$0xff] }
 0x160   : > { %v3490_v28 = vld [vmem:[%s5240_s2 + $0x90] sm:$0xff]  ;;  %v3479_v30 = vld [vmem:[%s5240_s2 + $0x38] sm:$0xff]  ;;  %v3485_v31 = vld [vmem:[%s5240_s2 + $0x68] sm:$0xff] }
 0x161   : > { %v3491_v32 = vld [vmem:[%s5240_s2 + $0x98] sm:$0xff]  ;;  %v3474_v33 = vld [vmem:[%s5240_s2 + $0x10] sm:$0xff]  ;;  %v3480_v34 = vld [vmem:[%s5240_s2 + $0x40] sm:$0xff] }
 0x162   : > { %v3486_v35 = vld [vmem:[%s5240_s2 + $0x70] sm:$0xff]  ;;  %v3492_v36 = vld [vmem:[%s5240_s2 + $0xa0] sm:$0xff]  ;;  %v3475_v37 = vld [vmem:[%s5240_s2 + $0x18] sm:$0xff] }
 0x163   : > { %v3498_v22 = vld [vmem:[#allocation3] sm:$0xff]  ;;  %v3481_v38 = vld [vmem:[%s5240_s2 + $0x48] sm:$0xff]  ;;  %v3487_v39 = vld [vmem:[%s5240_s2 + $0x78] sm:$0xff] }
 0x164   : > { %v3499_v21 = vld [vmem:[#allocation3 + $0x18] sm:$0xff]  ;;  %v3493_v40 = vld [vmem:[%s5240_s2 + $0xa8] sm:$0xff]  ;;  %v3476_v41 = vld [vmem:[%s5240_s2 + $0x20] sm:$0xff] }
 0x165   : > { %1001 = vmatpush.bf16.msra.mxu0 %v3499_v21  ;;  %3941 = vmatpush.bf16.msra.mxu1 %v3499_v21  ;;  %v3482_v42 = vld [vmem:[%s5240_s2 + $0x50] sm:$0xff]  ;;  %v3488_v43 = vld [vmem:[%s5240_s2 + $0x80] sm:$0xff]  ;;  %v3477_v45 = vld [vmem:[%s5240_s2 + $0x28] sm:$0xff] }
 0x166   : > { %3942 = vmatpush.bf16.msra.mxu2 %v3499_v21  ;;  %3943 = vmatpush.bf16.msra.mxu3 %v3499_v21  ;;  %v3494_v44 = vld [vmem:[%s5240_s2 + $0xb0] sm:$0xff]  ;;  %v3483_v46 = vld [vmem:[%s5240_s2 + $0x58] sm:$0xff]  ;;  %v3489_v47 = vld [vmem:[%s5240_s2 + $0x88] sm:$0xff] }
 0x167   : > { %v3495_v48 = vld [vmem:[%s5240_s2 + $0xb8] sm:$0xff] }
 0x169   : > { %1002 = vmatpush.bf16.msra.mxu0 %v3498_v22  ;;  %3944 = vmatpush.bf16.msra.mxu1 %v3498_v22 }
 0x16a   : > { %3945 = vmatpush.bf16.msra.mxu2 %v3498_v22  ;;  %3946 = vmatpush.bf16.msra.mxu3 %v3498_v22 }
 0x16d   : > { %1003 = vmatpush.bf16.msra.mxu0 %v3497_v23  ;;  %3947 = vmatpush.bf16.msra.mxu1 %v3497_v23 }
 0x16e   : > { %3948 = vmatpush.bf16.msra.mxu2 %v3497_v23  ;;  %3949 = vmatpush.bf16.msra.mxu3 %v3497_v23 }
 0x171   : > { %1004 = vmatpush.bf16.msra.mxu0 %v3496_v24  ;;  %3950 = vmatpush.bf16.msra.mxu1 %v3496_v24 }
 0x172   : > { %3951 = vmatpush.bf16.msra.mxu2 %v3496_v24  ;;  %3952 = vmatpush.bf16.msra.mxu3 %v3496_v24 }
 0x174   : > { %3079 = vmatmul.msk.bf16.vlgmr.msra.gmra.mxu0 %vm924_vm2, %v3472_v25  ;;  %3085 = vmatmul.msk.bf16.vlgmr.msra.gmra.mxu1 %vm924_vm2, %v3478_v26 }
 0x175   : > { %3091 = vmatmul.msk.bf16.vlgmr.msra.gmra.mxu2 %vm924_vm2, %v3484_v27  ;;  %3097 = vmatmul.msk.bf16.vlgmr.msra.gmra.mxu3 %vm924_vm2, %v3490_v28 }
 0x184   : > { %3080 = vmatmul.msk.bf16.gmra.mxu0 %vm924_vm2, %v3473_v29  ;;  %3086 = vmatmul.msk.bf16.gmra.mxu1 %vm924_vm2, %v3479_v30 }
 0x185   : > { %3092 = vmatmul.msk.bf16.gmra.mxu2 %vm924_vm2, %v3485_v31  ;;  %3098 = vmatmul.msk.bf16.gmra.mxu3 %vm924_vm2, %v3491_v32 }
 0x194   : > { %3081 = vmatmul.msk.bf16.gmra.mxu0 %vm924_vm2, %v3474_v33  ;;  %3087 = vmatmul.msk.bf16.gmra.mxu1 %vm924_vm2, %v3480_v34 }
 0x195   : > { %3093 = vmatmul.msk.bf16.gmra.mxu2 %vm924_vm2, %v3486_v35  ;;  %3099 = vmatmul.msk.bf16.gmra.mxu3 %vm924_vm2, %v3492_v36 }
 0x1a4   : > { %3082 = vmatmul.msk.bf16.gmra.mxu0 %vm924_vm2, %v3475_v37  ;;  %3088 = vmatmul.msk.bf16.gmra.mxu1 %vm924_vm2, %v3481_v38 }
 0x1a5   : > { %3094 = vmatmul.msk.bf16.gmra.mxu2 %vm924_vm2, %v3487_v39  ;;  %3100 = vmatmul.msk.bf16.gmra.mxu3 %vm924_vm2, %v3493_v40 }
 0x1b4   : > { %3083 = vmatmul.msk.bf16.gmra.mxu0 %vm924_vm2, %v3476_v41  ;;  %3089 = vmatmul.msk.bf16.gmra.mxu1 %vm924_vm2, %v3482_v42 }
 0x1b5   : > { %3095 = vmatmul.msk.bf16.gmra.mxu2 %vm924_vm2, %v3488_v43  ;;  %3101 = vmatmul.msk.bf16.gmra.mxu3 %vm924_vm2, %v3494_v44 }
 0x1c4   : > { %3084 = vmatmul.msk.bf16.gmra.mxu0 %vm924_vm2, %v3477_v45  ;;  %3090 = vmatmul.msk.bf16.gmra.mxu1 %vm924_vm2, %v3483_v46 }
 0x1c5   : > { %3096 = vmatmul.msk.bf16.gmra.mxu2 %vm924_vm2, %v3489_v47  ;;  %3102 = vmatmul.msk.bf16.gmra.mxu3 %vm924_vm2, %v3495_v48 }
 0x1f1   : > { %v4318_v49 = vpop.f32.mrf.mxu0  ;;  %v4320_v50 = vpop.f32.mrf.mxu1 }
 0x1f2   : > { %5304 = vst [vmem:[#allocation9_spill] sm:$0xff] %v4318_v49 }
 0x1f8   : > { %v4322_v51 = vpop.f32.mrf.mxu2  ;;  %v4324_v52 = vpop.f32.mrf.mxu3 }
 0x1f9   : > { %v4326_v53 = vpop.f32.mrf.mxu0  ;;  %v4328_v54 = vpop.f32.mrf.mxu1 }
 0x1fa   : > { %5305 = vst [vmem:[#allocation10_spill] sm:$0xff] %v4326_v53 }
 0x200   : > { %v4330_v55 = vpop.f32.mrf.mxu2  ;;  %v4332_v56 = vpop.f32.mrf.mxu3 }
 0x201   : > { %v4334_v57 = vpop.f32.mrf.mxu0  ;;  %v4336_v58 = vpop.f32.mrf.mxu1 }
 0x202   : > { %5306 = vst [vmem:[#allocation11_spill] sm:$0xff] %v4334_v57 }
 0x208   : > { %v4338_v59 = vpop.f32.mrf.mxu2  ;;  %v4340_v60 = vpop.f32.mrf.mxu3 }
 0x209   : > { %v4342_v61 = vpop.f32.mrf.mxu0  ;;  %v4344_v62 = vpop.f32.mrf.mxu1 }
 0x20a   : > { %5307 = vst [vmem:[#allocation12_spill] sm:$0xff] %v4342_v61 }
 0x210   : > { %v4346_v63 = vpop.f32.mrf.mxu2  ;;  %v4348_v0 = vpop.f32.mrf.mxu3 }
 0x211   : > { %v4350_v1 = vpop.f32.mrf.mxu0  ;;  %v4352_v2 = vpop.f32.mrf.mxu1 }
 0x212   : > { %5308 = vst [vmem:[#allocation13_spill] sm:$0xff] %v4350_v1 }
 0x213   : > { %5309 = vst [vmem:[#allocation14_spill] sm:$0xff] %v4352_v2 }
 0x218   : > { %v4354_v3 = vpop.f32.mrf.mxu2  ;;  %v4356_v4 = vpop.f32.mrf.mxu3 }
 0x219   : > { %5310 = vst [vmem:[#allocation15_spill] sm:$0xff] %v4356_v4  ;;  %v4358_v5 = vpop.f32.mrf.mxu0  ;;  %v4360_v6 = vpop.f32.mrf.mxu1 }
 0x21a   : > { %5311 = vst [vmem:[#allocation16_spill] sm:$0xff] %v4358_v5 }
 0x21b   : > { %5312 = vst [vmem:[#allocation17_spill] sm:$0xff] %v4360_v6 }
 0x220   : > { %v4362_v7 = vpop.f32.mrf.mxu2  ;;  %v4364_v8 = vpop.f32.mrf.mxu3 }
 0x221   : > { %v4366_v9 = vpop.f32.mrf.mxu0  ;;  %v4368_v10 = vpop.f32.mrf.mxu1 }
 0x222   : > { %5313 = vst [vmem:[#allocation18_spill] sm:$0xff] %v4368_v10 }
 0x228   : > { %v4370_v11 = vpop.f32.mrf.mxu2  ;;  %v4372_v12 = vpop.f32.mrf.mxu3 }
 0x229   : > { %5314 = vst [vmem:[#allocation19_spill] sm:$0xff] %v4372_v12  ;;  %v4374_v13 = vpop.f32.mrf.mxu0  ;;  %v4376_v14 = vpop.f32.mrf.mxu1 }
 0x22a   : > { %5315 = vst [vmem:[#allocation20_spill] sm:$0xff] %v4374_v13 }
 0x22b   : > { %5316 = vst [vmem:[#allocation21_spill] sm:$0xff] %v4376_v14 }
 0x230   : > { %v4378_v15 = vpop.f32.mrf.mxu2  ;;  %v4380_v16 = vpop.f32.mrf.mxu3 }
 0x231   : > { %5317 = vst [vmem:[#allocation22_spill] sm:$0xff] %v4380_v16  ;;  %v4382_v17 = vpop.f32.mrf.mxu0  ;;  %v4384_v18 = vpop.f32.mrf.mxu1 }
 0x232   : > { %5318 = vst [vmem:[#allocation23_spill] sm:$0xff] %v4382_v17 }
 0x233   : > { %5319 = vst [vmem:[#allocation24_spill] sm:$0xff] %v4384_v18 }
 0x238   : > { %v4386_v19 = vpop.f32.mrf.mxu2  ;;  %v4388_v20 = vpop.f32.mrf.mxu3 }
 0x239   : > { %5320 = vst [vmem:[#allocation25_spill] sm:$0xff] %v4386_v19  ;;  %v4390_v21 = vpop.f32.mrf.mxu0  ;;  %v4392_v22 = vpop.f32.mrf.mxu1 }
 0x23a   : > { %5321 = vst [vmem:[#allocation26_spill] sm:$0xff] %v4388_v20 }
 0x23b   : > { %5322 = vst [vmem:[#allocation27_spill] sm:$0xff] %v4390_v21 }
 0x23c   : > { %5323 = vst [vmem:[#allocation28_spill] sm:$0xff] %v4392_v22 }
 0x240   : > { %v4394_v23 = vpop.f32.mrf.mxu2  ;;  %v4396_v24 = vpop.f32.mrf.mxu3 }
 0x241   : > { %5324 = vst [vmem:[#allocation29_spill] sm:$0xff] %v4394_v23  ;;  %v4398_v25 = vpop.f32.mrf.mxu0  ;;  %v4400_v26 = vpop.f32.mrf.mxu1 }
 0x242   : > { %5325 = vst [vmem:[#allocation30_spill] sm:$0xff] %v4396_v24 }
 0x243   : > { %5326 = vst [vmem:[#allocation31_spill] sm:$0xff] %v4400_v26 }
 0x248   : > { %v4402_v27 = vpop.f32.mrf.mxu2  ;;  %v4404_v28 = vpop.f32.mrf.mxu3 }
 0x249   : > { %5327 = vst [vmem:[#allocation32_spill] sm:$0xff] %v4404_v28  ;;  %v4406_v29 = vpop.f32.mrf.mxu0  ;;  %v4408_v30 = vpop.f32.mrf.mxu1 }
 0x24a   : > { %5328 = vst [vmem:[#allocation33_spill] sm:$0xff] %v4408_v30 }
 0x24d   : > { %1128 = sbr.rel (%p586_p6) target bundleno = 1089 (0x441), region = 88 }
 0x250   : > { %v4410_v31 = vpop.f32.mrf.mxu2  ;;  %v4412_v32 = vpop.f32.mrf.mxu3 }
 0x251   : > { %5329 = vst [vmem:[#allocation34_spill] sm:$0xff] %v4412_v32 }
 0x252   : > { %v3202_v33 = vld [vmem:[%s5245_s7] sm:$0xf]  ;;  %v3524_v34 = vld [vmem:[%s5245_s7] sm:$0x30]  ;;  %vm1381_vm3 = vcmask 1045504   ;;  %v3510_v38 = vld [vmem:[%s5239_s1 + $0x50] sm:$0xff] }
 0x253   : > { %v3203_v35 = vor.u32 %v3524_v34, %v3202_v33  ;;  %v3500_v37 = vld [vmem:[%s5239_s1] sm:$0xff]  ;;  %vm1308_vm4 = vcmask 97280   ;;  %v3521_v40 = vld [vmem:[%s5239_s1 + $0xa8] sm:$0xff]  ;;  %v3511_v42 = vld [vmem:[%s5239_s1 + $0x58] sm:$0xff] }
 0x254   : > { %v3516_v39 = vld [vmem:[%s5239_s1 + $0x80] sm:$0xff]  ;;  %v3501_v41 = vld [vmem:[%s5239_s1 + $0x8] sm:$0xff]  ;;  %v3522_v44 = vld [vmem:[%s5239_s1 + $0xb0] sm:$0xff] }
 0x255   : > { %v1383_v36 = vsel %vm1381_vm3, %v3203_v35, 0  ;;  %v3517_v43 = vld [vmem:[%s5239_s1 + $0x88] sm:$0xff]  ;;  %v3502_v45 = vld [vmem:[%s5239_s1 + $0x10] sm:$0xff]  ;;  %v3512_v46 = vld [vmem:[%s5239_s1 + $0x60] sm:$0xff] }
 0x256   : > { %1392 = vmatpush.bf16.msra.mxu0 %v1383_v36  ;;  %3953 = vmatpush.bf16.msra.mxu1 %v1383_v36  ;;  %v3518_v47 = vld [vmem:[%s5239_s1 + $0x90] sm:$0xff]  ;;  %v3523_v48 = vld [vmem:[%s5239_s1 + $0xb8] sm:$0xff]  ;;  %v3513_v34 = vld [vmem:[%s5239_s1 + $0x68] sm:$0xff] }
 0x257   : > { %3954 = vmatpush.bf16.msra.mxu2 %v1383_v36  ;;  %3955 = vmatpush.bf16.msra.mxu3 %v1383_v36  ;;  %v3503_v33 = vld [vmem:[%s5239_s1 + $0x18] sm:$0xff]  ;;  %v3504_v36 = vld [vmem:[%s5239_s1 + $0x20] sm:$0xff] }
 0x258   : > { %v3519_v35 = vld [vmem:[%s5239_s1 + $0x98] sm:$0xff] }
 0x259   : > { %3204 = vmatmul.msk.bf16.vlgmr.msra.gmra.mxu0 %vm1308_vm4, %v3500_v37  ;;  %3214 = vmatmul.msk.bf16.vlgmr.msra.gmra.mxu1 %vm1308_vm4, %v3510_v38  ;;  %v3514_v37 = vld [vmem:[%s5239_s1 + $0x70] sm:$0xff]  ;;  %v3520_v38 = vld [vmem:[%s5239_s1 + $0xa0] sm:$0xff] }
 0x25a   : > { %3220 = vmatmul.msk.bf16.vlgmr.msra.gmra.mxu2 %vm1308_vm4, %v3516_v39  ;;  %3225 = vmatmul.msk.bf16.vlgmr.msra.gmra.mxu3 %vm1308_vm4, %v3521_v40  ;;  %v3505_v39 = vld [vmem:[%s5239_s1 + $0x28] sm:$0xff]  ;;  %v3515_v40 = vld [vmem:[%s5239_s1 + $0x78] sm:$0xff] }
 0x269   : > { %3205 = vmatmul.msk.bf16.gmra.mxu0 %vm1308_vm4, %v3501_v41  ;;  %3215 = vmatmul.msk.bf16.gmra.mxu1 %vm1308_vm4, %v3511_v42  ;;  %v3506_v41 = vld [vmem:[%s5239_s1 + $0x30] sm:$0xff]  ;;  %v3507_v42 = vld [vmem:[%s5239_s1 + $0x38] sm:$0xff] }
 0x26a   : > { %3221 = vmatmul.msk.bf16.gmra.mxu2 %vm1308_vm4, %v3517_v43  ;;  %3226 = vmatmul.msk.bf16.gmra.mxu3 %vm1308_vm4, %v3522_v44  ;;  %v3508_v43 = vld [vmem:[%s5239_s1 + $0x40] sm:$0xff] }
 0x26b   : > { %v4516_v44 = vld [vmem:[%s5246_s8] ss:$0 sm:$0xff] }
 0x279   : > { %3206 = vmatmul.msk.bf16.gmra.mxu0 %vm1308_vm4, %v3502_v45  ;;  %3216 = vmatmul.msk.bf16.gmra.mxu1 %vm1308_vm4, %v3512_v46 }
 0x27a   : > { %3222 = vmatmul.msk.bf16.gmra.mxu2 %vm1308_vm4, %v3518_v47  ;;  %3227 = vmatmul.msk.bf16.gmra.mxu3 %vm1308_vm4, %v3523_v48 }
 0x289   : > { %3207 = vmatmul.msk.bf16.gmra.mxu0 %vm1308_vm4, %v3503_v33  ;;  %3217 = vmatmul.msk.bf16.gmra.mxu1 %vm1308_vm4, %v3513_v34 }
 0x28a   : > { %3223 = vmatmul.msk.bf16.gmra.mxu2 %vm1308_vm4, %v3519_v35 }
 0x299   : > { %3208 = vmatmul.msk.bf16.gmra.mxu0 %vm1308_vm4, %v3504_v36  ;;  %3218 = vmatmul.msk.bf16.gmra.mxu1 %vm1308_vm4, %v3514_v37 }
 0x29a   : > { %3224 = vmatmul.msk.bf16.gmra.mxu2 %vm1308_vm4, %v3520_v38 }
 0x2a9   : > { %3209 = vmatmul.msk.bf16.gmra.mxu0 %vm1308_vm4, %v3505_v39  ;;  %3219 = vmatmul.msk.bf16.gmra.mxu1 %vm1308_vm4, %v3515_v40 }
 0x2b9   : > { %3210 = vmatmul.msk.bf16.gmra.mxu0 %vm1308_vm4, %v3506_v41 }
 0x2c9   : > { %3211 = vmatmul.msk.bf16.gmra.mxu0 %vm1308_vm4, %v3507_v42 }
 0x2d6   : > { %v1394_v45 = vpop.f32.mrf.mxu0  ;;  %v1444_v46 = vpop.f32.mrf.mxu1 }
 0x2d7   : > { %v1395_v47 = vadd.f32 %v4516_v44, %v1394_v45  ;;  %v1445_v48 = vadd.f32 %v4516_v44, %v1444_v46 }
 0x2d9   : > { %3212 = vmatmul.msk.bf16.gmra.mxu0 %vm1308_vm4, %v3508_v43  ;;  %v1514_v35 = vmax.f32 %v1395_v47, 0.0  ;;  %v1534_v36 = vmax.f32 %v1445_v48, 0.0 }
 0x2db   : > { %v4524_v2 = vmul.f32 %v1514_v35, %v4318_v49  ;;  %v4527_v43 = vmul.f32 %v1534_v36, %v4384_v18 }
 0x2dd   : > { %v1474_v33 = vpop.f32.mrf.mxu2  ;;  %v1499_v34 = vpop.f32.mrf.mxu3  ;;  %5330 = vst [vmem:[#allocation35_spill] sm:$0xff] %v4524_v2 }
 0x2de   : > { %v1396_v37 = vpop.f32.mrf.mxu0  ;;  %v1446_v38 = vpop.f32.mrf.mxu1  ;;  %v4530_v45 = vadd.f32 %v4516_v44, %v1474_v33 }
 0x2df   : > { %v1397_v39 = vadd.f32 %v4516_v44, %v1396_v37  ;;  %v1447_v40 = vadd.f32 %v4516_v44, %v1446_v38  ;;  %v3509_v38 = vld [vmem:[%s5239_s1 + $0x48] sm:$0xff] }
 0x2e1   : > { %v1515_v41 = vmax.f32 %v1397_v39, 0.0  ;;  %v1535_v42 = vmax.f32 %v1447_v40, 0.0 }
 0x2e3   : > { %v3625_v46 = vpack.c.bf16 %v1515_v41, %v1514_v35  ;;  %v4533_v47 = vmul.f32 %v1515_v41, %v4326_v53  ;;  %v3675_v48 = vpack.c.bf16 %v1535_v42, %v1534_v36  ;;  %v4536_v37 = vmul.f32 %v1535_v42, %v4392_v22 }
 0x2e4   : > { %v1546_v41 = vmax.f32 %v4530_v45, 0.0  ;;  %v4549_v22 = vadd.f32 %v4516_v44, %v1499_v34 }
 0x2e5   : > { %5331 = vst [vmem:[#allocation36_spill] sm:$0xff] %v4533_v47  ;;  %v1476_v39 = vpop.f32.mrf.mxu2  ;;  %v1501_v40 = vpop.f32.mrf.mxu3 }
 0x2e6   : > { %3626 = vst [vmem:[#allocation2 + $0xb0] sm:$0xff] %v3625_v46   ;;  %v1399_v33 = vpop.f32.mrf.mxu0  ;;  %v1449_v35 = vpop.f32.mrf.mxu1  ;;  %v1477_v36 = vadd.f32 %v4516_v44, %v1476_v39  ;;  %v4554_v49 = vadd.f32 %v4516_v44, %v1501_v40  ;;  %v5259_v39 = vmax.f32 %v4549_v22, 0.0 }
 0x2e7   : > { %3877 = vst [vmem:[#allocation2 + $0x18] sm:$0xff] %v3675_v48   ;;  %v1400_v53 = vadd.f32 %v4516_v44, %v1399_v33  ;;  %v1450_v18 = vadd.f32 %v4516_v44, %v1449_v35 }
 0x2e8   : > { %v1547_v46 = vmax.f32 %v1477_v36, 0.0  ;;  %v5258_v42 = vmax.f32 %v4554_v49, 0.0 }
 0x2e9   : > { %3213 = vmatmul.msk.bf16.gmra.mxu0 %vm1308_vm4, %v3509_v38  ;;  %v1516_v6 = vmax.f32 %v1400_v53, 0.0  ;;  %v1536_v38 = vmax.f32 %v1450_v18, 0.0 }
 0x2ea   : > { %v3705_v48 = vpack.c.bf16 %v1547_v46, %v1546_v41  ;;  %v3730_v40 = vpack.c.bf16 %v5258_v42, %v5259_v39 }
 0x2eb   : > { %v4565_v47 = vmul.f32 %v1516_v6, %v4334_v57  ;;  %v4568_v53 = vmul.f32 %v1536_v38, %v4400_v26 }
 0x2ec   : > { %3883 = vst [vmem:[#allocation2 + $0xa8] sm:$0xff] %v3705_v48  }
 0x2ed   : > { %v1479_v45 = vpop.f32.mrf.mxu2  ;;  %v1504_v36 = vpop.f32.mrf.mxu3  ;;  %3888 = vst [vmem:[#allocation2 + $0xb8] sm:$0xff] %v3730_v40  }
 0x2ee   : > { %v1401_v14 = vpop.f32.mrf.mxu0  ;;  %v1451_v34 = vpop.f32.mrf.mxu1  ;;  %5332 = vst [vmem:[#allocation37_spill] sm:$0xff] %v4565_v47  ;;  %v4571_v18 = vadd.f32 %v4516_v44, %v1479_v45 }
 0x2ef   : > { %v1402_v2 = vadd.f32 %v4516_v44, %v1401_v14  ;;  %v1452_v33 = vadd.f32 %v4516_v44, %v1451_v34 }
 0x2f0   : > { %v5267_v45 = vmax.f32 %v4571_v18, 0.0 }
 0x2f1   : > { %v1517_v35 = vmax.f32 %v1402_v2, 0.0  ;;  %v1537_v48 = vmax.f32 %v1452_v33, 0.0 }
 0x2f3   : > { %v3630_v14 = vpack.c.bf16 %v1517_v35, %v1516_v6  ;;  %v4574_v34 = vmul.f32 %v1517_v35, %v4342_v61  ;;  %v3680_v10 = vpack.c.bf16 %v1537_v48, %v1536_v38  ;;  %v4577_v17 = vmul.f32 %v1537_v48, %v4408_v30 }
 0x2f4   : > { %v1505_v48 = vadd.f32 %v4516_v44, %v1504_v36 }
 0x2f5   : > { %5333 = vst [vmem:[#allocation38_spill] sm:$0xff] %v4574_v34  ;;  %v1481_v2 = vpop.f32.mrf.mxu2  ;;  %v1506_v33 = vpop.f32.mrf.mxu3 }
 0x2f6   : > { %3868 = vst [vmem:[#allocation2] sm:$0xff] %v3630_v14   ;;  %v1404_v42 = vpop.f32.mrf.mxu0  ;;  %v1454_v39 = vpop.f32.mrf.mxu1  ;;  %v4583_v6 = vadd.f32 %v4516_v44, %v1481_v2  ;;  %v1507_v2 = vadd.f32 %v4516_v44, %v1506_v33  ;;  %v1558_v26 = vmax.f32 %v1505_v48, 0.0  ;;  %v4607_v33 = vmul.f32 %v1547_v46, %v4394_v23 }
 0x2f7   : > { %3878 = vst [vmem:[#allocation2 + $0x98] sm:$0xff] %v3680_v10   ;;  %v1405_v14 = vadd.f32 %v4516_v44, %v1404_v42  ;;  %v4595_v40 = vadd.f32 %v4516_v44, %v1454_v39  ;;  %v4604_v39 = vmul.f32 %v1546_v41, %v4386_v19 }
 0x2f8   : > { %v5266_v35 = vmax.f32 %v4583_v6, 0.0  ;;  %v1559_v38 = vmax.f32 %v1507_v2, 0.0 }
 0x2f9   : > { %v1518_v57 = vmax.f32 %v1405_v14, 0.0  ;;  %v5271_v42 = vmax.f32 %v4595_v40, 0.0 }
 0x2fa   : > { %v3710_v10 = vpack.c.bf16 %v5266_v35, %v5267_v45  ;;  %v3735_v35 = vpack.c.bf16 %v1559_v38, %v1558_v26 }
 0x2fb   : > { %v4612_v2 = vmul.f32 %v1518_v57, %v4350_v1 }
 0x2fc   : > { %3884 = vst [vmem:[#allocation2 + $0x68] sm:$0xff] %v3710_v10  }
 0x2fd   : > { %v1484_v30 = vpop.f32.mrf.mxu2  ;;  %v1509_v61 = vpop.f32.mrf.mxu3  ;;  %3889 = vst [vmem:[#allocation2 + $0x20] sm:$0xff] %v3735_v35  }
 0x2fe   : > { %v1406_v47 = vpop.f32.mrf.mxu0  ;;  %v1456_v36 = vpop.f32.mrf.mxu1  ;;  %v1510_v48 = vadd.f32 %v4516_v44, %v1509_v61  ;;  %v4622_v46 = vadd.f32 %v4516_v44, %v1484_v30 }
 0x2ff   : > { %v1407_v34 = vadd.f32 %v4516_v44, %v1406_v47  ;;  %v4601_v21 = vadd.f32 %v4516_v44, %v1456_v36 }
 0x300   : > { %v1560_v61 = vmax.f32 %v1510_v48, 0.0  ;;  %v5277_v30 = vmax.f32 %v4622_v46, 0.0 }
 0x301   : > { %v1519_v10 = vmax.f32 %v1407_v34, 0.0  ;;  %v5270_v14 = vmax.f32 %v4601_v21, 0.0 }
 0x302   : > { %v1708_v34 = vmul.f32 %v1560_v61, %v4404_v28 }
 0x303   : > { %v3635_v47 = vpack.c.bf16 %v1519_v10, %v1518_v57  ;;  %v4615_v36 = vmul.f32 %v1519_v10, %v4358_v5  ;;  %v3685_v41 = vpack.c.bf16 %v5270_v14, %v5271_v42  ;;  %v1706_v42 = vmul.f32 %v1558_v26, %v4388_v20 }
 0x304   : > { %v1707_v57 = vmul.f32 %v1559_v38, %v4396_v24  ;;  %v5334_v26 = vmax.f32 %v4549_v22, 0.0 }
 0x305   : > { %3869 = vst [vmem:[#allocation2 + $0x10] sm:$0xff] %v3635_v47   ;;  %v1486_v35 = vpop.f32.mrf.mxu2  ;;  %v1511_v45 = vpop.f32.mrf.mxu3 }
 0x306   : > { %3879 = vst [vmem:[#allocation2 + $0x38] sm:$0xff] %v3685_v41   ;;  %v1409_v10 = vpop.f32.mrf.mxu0  ;;  %v1459_v23 = vpop.f32.mrf.mxu1  ;;  %v4629_v19 = vadd.f32 %v4516_v44, %v1486_v35  ;;  %v1512_v14 = vadd.f32 %v4516_v44, %v1511_v45  ;;  %v1704_v20 = vmul.f32 %v5334_v26, %v4372_v12 }
 0x307   : > { %v1410_v45 = vadd.f32 %v4516_v44, %v1409_v10  ;;  %v4644_v5 = vadd.f32 %v4516_v44, %v1459_v23  ;;  %v1732_v10 = vpack.c.bf16 %v1707_v57, %v1706_v42 }
 0x308   : > { %v5276_v48 = vmax.f32 %v4629_v19, 0.0  ;;  %v1561_v47 = vmax.f32 %v1512_v14, 0.0 }
 0x309   : > { %v1520_v24 = vmax.f32 %v1410_v45, 0.0  ;;  %v5281_v23 = vmax.f32 %v4644_v5, 0.0 }
 0x30a   : > { %v3715_v41 = vpack.c.bf16 %v5276_v48, %v5277_v30  ;;  %v1709_v35 = vmul.f32 %v1561_v47, %v4412_v32  ;;  %v3740_v1 = vpack.c.bf16 %v1561_v47, %v1560_v61  ;;  %v5335_v48 = vmax.f32 %v4554_v49, 0.0 }
 0x30b   : > { %v4659_v49 = vmul.f32 %v1520_v24, %v4366_v9 }
 0x30c   : > { %3885 = vst [vmem:[#allocation2 + $0x30] sm:$0xff] %v3715_v41   ;;  %v1733_v28 = vpack.c.bf16 %v1709_v35, %v1708_v34  ;;  %v1705_v38 = vmul.f32 %v5335_v48, %v4380_v16 }
 0x30d   : > { %v1489_v14 = vpop.f32.mrf.mxu2  ;;  %3890 = vst [vmem:[#allocation2 + $0x8] sm:$0xff] %v3740_v1  }
 0x30e   : > { %v1411_v30 = vpop.f32.mrf.mxu0  ;;  %v1461_v32 = vpop.f32.mrf.mxu1  ;;  %1880 = vmatpush.bf16.msrb.mxu3 %v1733_v28  ;;  %v1731_v47 = vpack.c.bf16 %v1705_v38, %v1704_v20 }
 0x30f   : > { %v1412_v61 = vadd.f32 %v4516_v44, %v1411_v30  ;;  %v4655_v34 = vadd.f32 %v4516_v44, %v1461_v32  ;;  %v1490_v32 = vadd.f32 %v4516_v44, %v1489_v14 }
 0x311   : > { %v1521_v1 = vmax.f32 %v1412_v61, 0.0  ;;  %v5280_v22 = vmax.f32 %v4655_v34, 0.0  ;;  %v1552_v35 = vmax.f32 %v1490_v32, 0.0 }
 0x312   : > { %1881 = vmatpush.bf16.msrb.mxu3 %v1732_v10 }
 0x313   : > { %v3640_v48 = vpack.c.bf16 %v1521_v1, %v1520_v24  ;;  %v4662_v28 = vmul.f32 %v1521_v1, %v4374_v13  ;;  %v3690_v42 = vpack.c.bf16 %v5280_v22, %v5281_v23 }
 0x315   : > { %3870 = vst [vmem:[#allocation2 + $0x48] sm:$0xff] %v3640_v48   ;;  %v1491_v57 = vpop.f32.mrf.mxu2 }
 0x316   : > { %3880 = vst [vmem:[#allocation2 + $0x50] sm:$0xff] %v3690_v42   ;;  %v1414_v20 = vpop.f32.mrf.mxu0  ;;  %v1464_v41 = vpop.f32.mrf.mxu1  ;;  %v1492_v24 = vadd.f32 %v4516_v44, %v1491_v57  ;;  %1882 = vmatpush.bf16.msrb.mxu3 %v1731_v47 }
 0x317   : > { %v4673_v38 = vadd.f32 %v4516_v44, %v1414_v20  ;;  %v1465_v14 = vadd.f32 %v4516_v44, %v1464_v41 }
 0x318   : > { %v1553_v45 = vmax.f32 %v1492_v24, 0.0 }
 0x319   : > { %v5285_v47 = vmax.f32 %v4673_v38, 0.0  ;;  %v1542_v32 = vmax.f32 %v1465_v14, 0.0 }
 0x31a   : > { %v3720_v26 = vpack.c.bf16 %v1553_v45, %v1552_v35  ;;  %v1701_v12 = vmul.f32 %v1553_v45, %v4348_v0 }
 0x31c   : > { %3886 = vst [vmem:[#allocation2 + $0x58] sm:$0xff] %v3720_v26  }
 0x31d   : > { %v1494_v10 = vpop.f32.mrf.mxu2 }
 0x31e   : > { %v1416_v61 = vpop.f32.mrf.mxu0  ;;  %v1466_v1 = vpop.f32.mrf.mxu1  ;;  %v1495_v57 = vadd.f32 %v4516_v44, %v1494_v10 }
 0x31f   : > { %v4677_v48 = vadd.f32 %v4516_v44, %v1416_v61  ;;  %v1467_v42 = vadd.f32 %v4516_v44, %v1466_v1 }
 0x320   : > { %v1554_v30 = vmax.f32 %v1495_v57, 0.0 }
 0x321   : > { %v5286_v24 = vmax.f32 %v4677_v48, 0.0  ;;  %v1543_v26 = vmax.f32 %v1467_v42, 0.0  ;;  %v1700_v42 = vmul.f32 %v1552_v35, %v4340_v60 }
 0x322   : > { %v1702_v23 = vmul.f32 %v1554_v30, %v4356_v4 }
 0x323   : > { %v3645_v20 = vpack.c.bf16 %v5286_v24, %v5285_v47  ;;  %v3695_v41 = vpack.c.bf16 %v1543_v26, %v1542_v32 }
 0x325   : > { %3871 = vst [vmem:[#allocation2 + $0x60] sm:$0xff] %v3645_v20   ;;  %v1496_v61 = vpop.f32.mrf.mxu2 }
 0x326   : > { %3881 = vst [vmem:[#allocation2 + $0x70] sm:$0xff] %v3695_v41   ;;  %v1419_v22 = vpop.f32.mrf.mxu0  ;;  %v1469_v1 = vpop.f32.mrf.mxu1  ;;  %v1497_v10 = vadd.f32 %v4516_v44, %v1496_v61  ;;  %v5336_v61 = vmax.f32 %v4622_v46, 0.0  ;;  %v1690_v46 = vmul.f32 %v1542_v32, %v4354_v3 }
 0x327   : > { %v1470_v16 = vadd.f32 %v4516_v44, %v1469_v1  ;;  %v4694_v20 = vadd.f32 %v4516_v44, %v1419_v22  ;;  %v5337_v1 = vmax.f32 %v4629_v19, 0.0  ;;  %v1691_v19 = vmul.f32 %v1543_v26, %v4362_v7 }
 0x328   : > { %v1555_v14 = vmax.f32 %v1497_v10, 0.0  ;;  %v1698_v24 = vmul.f32 %v5336_v61, %v4324_v52 }
 0x329   : > { %v1544_v41 = vmax.f32 %v1470_v16, 0.0  ;;  %v1699_v10 = vmul.f32 %v5337_v1, %v4332_v56 }
 0x32a   : > { %v3725_v13 = vpack.c.bf16 %v1555_v14, %v1554_v30  ;;  %v1703_v47 = vmul.f32 %v1555_v14, %v4364_v8  ;;  %v1729_v30 = vpack.c.bf16 %v1701_v12, %v1700_v42  ;;  %v5338_v42 = vmax.f32 %v4571_v18, 0.0 }
 0x32b   : > { %v1692_v16 = vmul.f32 %v1544_v41, %v4370_v11  ;;  %v1728_v14 = vpack.c.bf16 %v1699_v10, %v1698_v24  ;;  %v1724_v24 = vpack.c.bf16 %v1691_v19, %v1690_v46  ;;  %v5341_v18 = vmax.f32 %v4655_v34, 0.0 }
 0x32c   : > { %3887 = vst [vmem:[#allocation2 + $0x80] sm:$0xff] %v3725_v13   ;;  %v1730_v57 = vpack.c.bf16 %v1703_v47, %v1702_v23  ;;  %v1524_v23 = vmax.f32 %v4694_v20, 0.0 }
 0x32e   : > { %v1421_v35 = vpop.f32.mrf.mxu0  ;;  %v1471_v4 = vpop.f32.mrf.mxu1  ;;  %1883 = vmatpush.bf16.msrb.mxu3 %v1730_v57  ;;  %v5339_v57 = vmax.f32 %v4583_v6, 0.0  ;;  %v5342_v6 = vmax.f32 %v4595_v40, 0.0 }
 0x32f   : > { %v1422_v45 = vadd.f32 %v4516_v44, %v1421_v35  ;;  %v1472_v13 = vadd.f32 %v4516_v44, %v1471_v4  ;;  %v1696_v4 = vmul.f32 %v5338_v42, %v4402_v27 }
 0x330   : > { %v1697_v20 = vmul.f32 %v5339_v57, %v4410_v31 }
 0x331   : > { %v1525_v22 = vmax.f32 %v1422_v45, 0.0  ;;  %v1545_v47 = vmax.f32 %v1472_v13, 0.0  ;;  %v1686_v45 = vmul.f32 %v5342_v6, %v4322_v51  ;;  %v5343_v13 = vmax.f32 %v4601_v21, 0.0 }
 0x332   : > { %1884 = vmatpush.bf16.msrb.mxu3 %v1729_v30  ;;  %v1727_v26 = vpack.c.bf16 %v1697_v20, %v1696_v4  ;;  %v1689_v30 = vmul.f32 %v5341_v18, %v4346_v63  ;;  %v5345_v21 = vpack.c.bf16 %v4577_v17, %v4568_v53  ;;  %v1672_v6 = vmul.f32 %v1524_v23, %v4398_v25 }
 0x333   : > { %v3650_v61 = vpack.c.bf16 %v1525_v22, %v1524_v23  ;;  %v3700_v1 = vpack.c.bf16 %v1545_v47, %v1544_v41  ;;  %v1693_v12 = vmul.f32 %v1545_v47, %v4378_v15  ;;  %v5340_v41 = vmax.f32 %v4644_v5, 0.0 }
 0x334   : > { %v5344_v5 = vpack.c.bf16 %v4607_v33, %v4604_v39  ;;  %v5346_v39 = vpack.c.bf16 %v4536_v37, %v4527_v43  ;;  %v3238_v43 = vld [vmem:[%s5241_s3 + $0x8] sm:$0xf]  ;;  %v3527_v37 = vld [vmem:[%s5241_s3 + $0x10] sm:$0xf0]  ;;  %v1673_v18 = vmul.f32 %v1525_v22, %v4406_v29 }
 0x335   : > { %3872 = vst [vmem:[#allocation2 + $0x28] sm:$0xff] %v3650_v61   ;;  %v1725_v35 = vpack.c.bf16 %v1693_v12, %v1692_v16  ;;  %v1688_v10 = vmul.f32 %v5340_v41, %v4338_v59  ;;  %v1687_v16 = vmul.f32 %v5343_v13, %v4330_v55  ;;  %v5348_v13 = vmax.f32 %v4677_v48, 0.0  ;;  %v3250_v48 = vld [vmem:[%s5241_s3 + $0x20] sm:$0xf] }
 0x336   : > { %3882 = vst [vmem:[#allocation2 + $0xa0] sm:$0xff] %v3700_v1   ;;  %v1424_v32 = vpop.f32.mrf.mxu0  ;;  %1885 = vmatpush.bf16.msrb.mxu3 %v1728_v14 }
 0x337   : > { %1851 = vmatpush.bf16.msrb.mxu2 %v1725_v35  ;;  %v1425_v47 = vadd.f32 %v4516_v44, %v1424_v32  ;;  %v1723_v46 = vpack.c.bf16 %v1689_v30, %v1688_v10  ;;  %v1722_v1 = vpack.c.bf16 %v1687_v16, %v1686_v45  ;;  %v3239_v10 = vor.u32 %v3527_v37, %v3238_v43  ;;  %v5347_v45 = vld [vmem:[#allocation27_spill] sm:$0xff] }
 0x338   : > { %v1671_v16 = vmul.f32 %v5348_v13, %v5347_v45  ;;  %v5358_v43 = vld [vmem:[#allocation35_spill] sm:$0xff]  ;;  %v3533_v13 = vld [vmem:[%s5241_s3 + $0x40] sm:$0xf0] }
 0x339   : > { %v1526_v19 = vmax.f32 %v1425_v47, 0.0  ;;  %v1715_v47 = vpack.c.bf16 %v1673_v18, %v1672_v6  ;;  %v3262_v45 = vld [vmem:[%s5241_s3 + $0x38] sm:$0xf] }
 0x33a   : > { %1886 = vmatpush.bf16.msrb.mxu3 %v1727_v26 }
 0x33b   : > { %1852 = vmatpush.bf16.msrb.mxu2 %v1724_v24  ;;  %v1674_v41 = vmul.f32 %v1526_v19, %v4320_v50 }
 0x33e   : > { %v1426_v14 = vpop.f32.mrf.mxu0  ;;  %1887 = vmatpush.bf16.msrb.mxu3 %v5344_v5  ;;  %v5349_v5 = vld [vmem:[#allocation23_spill] sm:$0xff] }
 0x33f   : > { %v1427_v34 = vadd.f32 %v4516_v44, %v1426_v14  ;;  %1853 = vmatpush.bf16.msrb.mxu2 %v1723_v46 }
 0x341   : > { %v1527_v61 = vmax.f32 %v1427_v34, 0.0  ;;  %1888 = vmatmul.bf16.vlgmr.msrb.gmra.mxu3 %v3239_v10  ;;  %v5350_v34 = vmax.f32 %v4673_v38, 0.0  ;;  %v5351_v38 = vpack.c.bf16 %v4662_v28, %v4659_v49  ;;  %v3230_v49 = vld [vmem:[%s5241_s3] sm:$0xf]  ;;  %v3526_v28 = vld [vmem:[%s5241_s3 + $0x8] sm:$0xf0] }
 0x342   : > { %v5360_v10 = vld [vmem:[#allocation21_spill] sm:$0xff] }
 0x343   : > { %v3655_v40 = vpack.c.bf16 %v1527_v61, %v1526_v19  ;;  %1854 = vmatpush.bf16.msrb.mxu2 %v1722_v1  ;;  %v1675_v26 = vmul.f32 %v1527_v61, %v4328_v54  ;;  %v1670_v19 = vmul.f32 %v5350_v34, %v5349_v5  ;;  %v3263_v5 = vor.u32 %v3533_v13, %v3262_v45  ;;  %v1735_v13 = vld [vmem:[#allocation5 + $0x20] sm:$0xff] }
 0x345   : > { %3873 = vst [vmem:[#allocation2 + $0x40] sm:$0xff] %v3655_v40   ;;  %v1716_v30 = vpack.c.bf16 %v1675_v26, %v1674_v41  ;;  %v1714_v1 = vpack.c.bf16 %v1671_v16, %v1670_v19  ;;  %v5356_v26 = vld [vmem:[#allocation18_spill] sm:$0xff] }
 0x346   : > { %v1429_v12 = vpop.f32.mrf.mxu0  ;;  %v5362_v16 = vld [vmem:[#allocation14_spill] sm:$0xff] }
 0x347   : > { %1855 = vmatpush.bf16.msrb.mxu2 %v5345_v21  ;;  %v1430_v42 = vadd.f32 %v4516_v44, %v1429_v12  ;;  %v3530_v21 = vld [vmem:[%s5241_s3 + $0x28] sm:$0xf0] }
 0x349   : > { %v1528_v4 = vmax.f32 %v1430_v42, 0.0  ;;  %v3251_v42 = vor.u32 %v3530_v21, %v3250_v48  ;;  %v3244_v48 = vld [vmem:[%s5241_s3 + $0x24] sm:$0xf0] }
 0x34b   : > { %1856 = vmatpush.bf16.msrb.mxu2 %v5346_v39  ;;  %v1676_v35 = vmul.f32 %v1528_v4, %v4336_v58  ;;  %v5352_v39 = vpack.c.bf16 %v4615_v36, %v4612_v2  ;;  %v3231_v36 = vor.u32 %v3526_v28, %v3230_v49  ;;  %v3534_v49 = vld [vmem:[%s5241_s3 + $0x4c] sm:$0xf]  ;;  %v3268_v28 = vld [vmem:[%s5241_s3 + $0x54] sm:$0xf0] }
 0x34e   : > { %v1431_v33 = vpop.f32.mrf.mxu0 }
 0x34f   : > { %v1432_v57 = vadd.f32 %v4516_v44, %v1431_v33 }
 0x351   : > { %v1529_v20 = vmax.f32 %v1432_v57, 0.0  ;;  %1893 = vmatmul.bf16.gmra.mxu3 %v3251_v42  ;;  %v5353_v57 = vld [vmem:[#allocation38_spill] sm:$0xff] }
 0x352   : > { %v3254_v42 = vld [vmem:[%s5241_s3 + $0x30] sm:$0xf] }
 0x353   : > { %v3660_v32 = vpack.c.bf16 %v1529_v20, %v1528_v4  ;;  %v1677_v24 = vmul.f32 %v1529_v20, %v4344_v62  ;;  %v5354_v20 = vld [vmem:[#allocation37_spill] sm:$0xff] }
 0x355   : > { %3874 = vst [vmem:[#allocation2 + $0x78] sm:$0xff] %v3660_v32   ;;  %v1717_v17 = vpack.c.bf16 %v1677_v24, %v1676_v35  ;;  %v5355_v35 = vpack.c.bf16 %v5353_v57, %v5354_v20  ;;  %v3256_v57 = vld [vmem:[%s5241_s3 + $0x3c] sm:$0xf0] }
 0x356   : > { %v1434_v53 = vpop.f32.mrf.mxu0 }
 0x357   : > { %1822 = vmatpush.bf16.msrb.mxu1 %v1717_v17  ;;  %v1435_v46 = vadd.f32 %v4516_v44, %v1434_v53  ;;  %v5357_v53 = vld [vmem:[#allocation36_spill] sm:$0xff] }
 0x358   : > { %v5359_v37 = vpack.c.bf16 %v5357_v53, %v5358_v43 }
 0x359   : > { %v1530_v61 = vmax.f32 %v1435_v46, 0.0  ;;  %v3525_v46 = vld [vmem:[%s5241_s3 + $0x4] sm:$0xf] }
 0x35b   : > { %1823 = vmatpush.bf16.msrb.mxu1 %v1716_v30 }
 0x35e   : > { %v1436_v14 = vpop.f32.mrf.mxu0 }
 0x35f   : > { %1824 = vmatpush.bf16.msrb.mxu1 %v1715_v47  ;;  %v1437_v22 = vadd.f32 %v4516_v44, %v1436_v14  ;;  %v1678_v47 = vmul.f32 %v1530_v61, %v5362_v16  ;;  %v3232_v14 = vld [vmem:[%s5241_s3 + $0xc] sm:$0xf0] }
 0x360   : > { %v3235_v19 = vor.u32 %v3525_v46, %v3232_v14 }
 0x361   : > { %v1531_v40 = vmax.f32 %v1437_v22, 0.0  ;;  %1898 = vmatmul.bf16.gmra.mxu3 %v3263_v5  ;;  %v3242_v22 = vld [vmem:[%s5241_s3 + $0x18] sm:$0xf] }
 0x363   : > { %1825 = vmatpush.bf16.msrb.mxu1 %v1714_v1  ;;  %v3665_v23 = vpack.c.bf16 %v1531_v40, %v1530_v61  ;;  %v3529_v61 = vld [vmem:[%s5241_s3 + $0x20] sm:$0xf0] }
 0x364   : > { %v3243_v1 = vor.u32 %v3529_v61, %v3242_v22 }
 0x365   : > { %3875 = vst [vmem:[#allocation2 + $0x88] sm:$0xff] %v3665_v23   ;;  %v3536_v23 = vld [vmem:[%s5241_s3 + $0x58] sm:$0xf0] }
 0x366   : > { %v1439_v12 = vpop.f32.mrf.mxu0 }
 0x367   : > { %1826 = vmatpush.bf16.msrb.mxu1 %v5351_v38  ;;  %v1440_v33 = vadd.f32 %v4516_v44, %v1439_v12  ;;  %v3528_v12 = vld [vmem:[%s5241_s3 + $0x1c] sm:$0xf] }
 0x368   : > { %v3247_v38 = vor.u32 %v3528_v12, %v3244_v48 }
 0x369   : > { %v1532_v32 = vmax.f32 %v1440_v33, 0.0 }
 0x36b   : > { %1827 = vmatpush.bf16.msrb.mxu1 %v5352_v39  ;;  %v1680_v17 = vmul.f32 %v1532_v32, %v5356_v26  ;;  %v3532_v39 = vld [vmem:[%s5241_s3 + $0x38] sm:$0xf0] }
 0x36c   : > { %v3255_v33 = vor.u32 %v3532_v39, %v3254_v42 }
 0x36e   : > { %v1441_v4 = vpop.f32.mrf.mxu0 }
 0x36f   : > { %1828 = vmatpush.bf16.msrb.mxu1 %v5355_v35  ;;  %v1442_v24 = vadd.f32 %v4516_v44, %v1441_v4  ;;  %v5361_v44 = vld [vmem:[#allocation17_spill] sm:$0xff]  ;;  %v3531_v4 = vld [vmem:[%s5241_s3 + $0x34] sm:$0xf] }
 0x370   : > { %v1679_v30 = vmul.f32 %v1531_v40, %v5361_v44  ;;  %v3274_v40 = vld [vmem:[%s5241_s3 + $0x50] sm:$0xf]  ;;  %v3259_v20 = vor.u32 %v3531_v4, %v3256_v57  ;;  %v3266_v35 = vld [vmem:[%s5241_s3 + $0x48] sm:$0xf] }
 0x371   : > { %v1533_v2 = vmax.f32 %v1442_v24, 0.0  ;;  %v3275_v21 = vor.u32 %v3536_v23, %v3274_v40  ;;  %v1737_v23 = vld [vmem:[#allocation5 + $0x28] sm:$0xff] }
 0x372   : > { %v1718_v34 = vpack.c.bf16 %v1679_v30, %v1678_v47 }
 0x373   : > { %1829 = vmatpush.bf16.msrb.mxu1 %v5359_v37  ;;  %v3670_v41 = vpack.c.bf16 %v1533_v2, %v1532_v32  ;;  %v1681_v18 = vmul.f32 %v1533_v2, %v5360_v10  ;;  %1903 = vmatmul.bf16.gmra.mxu3 %v3275_v21  ;;  %v3535_v32 = vld [vmem:[%s5241_s3 + $0x50] sm:$0xf0]  ;;  %v3271_v2 = vor.u32 %v3534_v49, %v3268_v28  ;;  %v1739_v49 = vld [vmem:[#allocation5 + $0x18] sm:$0xff] }
 0x374   : > { %v3267_v24 = vor.u32 %v3535_v32, %v3266_v35 }
 0x375   : > { %3876 = vst [vmem:[#allocation2 + $0x90] sm:$0xff] %v3670_v41   ;;  %v1719_v6 = vpack.c.bf16 %v1681_v18, %v1680_v17  ;;  %v1734_v41 = vld [vmem:[#allocation5 + $0x38] sm:$0xff] }
 0x376   : > { %1830 = vmatmul.bf16.vlgmr.msrb.gmra.mxu1 %v3231_v36 }
 0x377   : > { %1857 = vmatpush.bf16.msrb.mxu2 %v1719_v6 }
 0x37b   : > { %1858 = vmatpush.bf16.msrb.mxu2 %v1718_v34  ;;  %v1736_v34 = vld [vmem:[#allocation5 + $0x30] sm:$0xff] }
 0x37e   : > { %1859 = vmatmul.bf16.vlgmr.msrb.gmra.mxu2 %v3235_v19 }
 0x386   : > { %1835 = vmatmul.bf16.gmra.mxu1 %v3243_v1 }
 0x38e   : > { %1864 = vmatmul.bf16.gmra.mxu2 %v3247_v38 }
 0x396   : > { %1840 = vmatmul.bf16.gmra.mxu1 %v3255_v33  ;;  %v1738_v33 = vld [vmem:[#allocation5] sm:$0xff] }
 0x39e   : > { %1869 = vmatmul.bf16.gmra.mxu2 %v3259_v20 }
 0x3a6   : > { %1845 = vmatmul.bf16.gmra.mxu1 %v3267_v24 }
 0x3ae   : > { %1874 = vmatmul.bf16.gmra.mxu2 %v3271_v2 }
 0x3c4   : > { %v1889_v26 = vpop.f32.mrf.mxu3 }
 0x3cc   : > { %v1891_v53 = vpop.f32.mrf.mxu3 }
 0x3d4   : > { %v1894_v6 = vpop.f32.mrf.mxu3 }
 0x3dc   : > { %v1896_v19 = vpop.f32.mrf.mxu3 }
 0x3e4   : > { %v1899_v21 = vpop.f32.mrf.mxu3 }
 0x3ec   : > { %v1901_v35 = vpop.f32.mrf.mxu3 }
 0x3f3   : > { %v1831_v36 = vpop.f32.mrf.mxu1 }
 0x3fb   : > { %v1833_v17 = vpop.f32.mrf.mxu1 }
 0x401   : > { %v1860_v43 = vpop.f32.mrf.mxu2 }
 0x402   : > { %v1861_v37 = vadd.f32 %v1860_v43, %v1831_v36  ;;  %v1740_v43 = vld [vmem:[#allocation5 + $0x10] sm:$0xff] }
 0x403   : > { %v1836_v44 = vpop.f32.mrf.mxu1 }
 0x404   : > { %v1890_v10 = vadd.f32 %v1889_v26, %v1861_v37 }
 0x406   : > { %v1909_v18 = vadd.f32 %v1890_v10, %v1734_v41 }
 0x408   : > { %1917 = vst [vmem:[#allocation5 + $0x38] sm:$0xff] %v1909_v18 }
 0x409   : > { %v1862_v30 = vpop.f32.mrf.mxu2 }
 0x40a   : > { %v1863_v45 = vadd.f32 %v1862_v30, %v1833_v17  ;;  %v1904_v17 = vpop.f32.mrf.mxu3  ;;  %v1741_v30 = vld [vmem:[#allocation5 + $0x8] sm:$0xff] }
 0x40b   : > { %v1838_v14 = vpop.f32.mrf.mxu1 }
 0x40c   : > { %v1892_v16 = vadd.f32 %v1891_v53, %v1863_v45 }
 0x40e   : > { %v1910_v47 = vadd.f32 %v1892_v16, %v1735_v13 }
 0x410   : > { %1918 = vst [vmem:[#allocation5 + $0x20] sm:$0xff] %v1910_v47 }
 0x411   : > { %v1865_v46 = vpop.f32.mrf.mxu2 }
 0x412   : > { %v1866_v5 = vadd.f32 %v1865_v46, %v1836_v44 }
 0x413   : > { %v1841_v12 = vpop.f32.mrf.mxu1 }
 0x414   : > { %v1895_v22 = vadd.f32 %v1894_v6, %v1866_v5  ;;  %v1906_v6 = vpop.f32.mrf.mxu3 }
 0x416   : > { %v1911_v61 = vadd.f32 %v1895_v22, %v1736_v34 }
 0x418   : > { %1919 = vst [vmem:[#allocation5 + $0x30] sm:$0xff] %v1911_v61 }
 0x419   : > { %v1867_v1 = vpop.f32.mrf.mxu2 }
 0x41a   : > { %v1868_v40 = vadd.f32 %v1867_v1, %v1838_v14 }
 0x41b   : > { %v1843_v57 = vpop.f32.mrf.mxu1 }
 0x41c   : > { %v1897_v48 = vadd.f32 %v1896_v19, %v1868_v40 }
 0x41e   : > { %v1912_v38 = vadd.f32 %v1897_v48, %v1737_v23 }
 0x420   : > { %1920 = vst [vmem:[#allocation5 + $0x28] sm:$0xff] %v1912_v38 }
 0x421   : > { %v1870_v42 = vpop.f32.mrf.mxu2 }
 0x422   : > { %v1871_v39 = vadd.f32 %v1870_v42, %v1841_v12 }
 0x423   : > { %v1846_v36 = vpop.f32.mrf.mxu1 }
 0x424   : > { %v1900_v4 = vadd.f32 %v1899_v21, %v1871_v39 }
 0x426   : > { %v1913_v20 = vadd.f32 %v1900_v4, %v1738_v33 }
 0x428   : > { %1921 = vst [vmem:[#allocation5] sm:$0xff] %v1913_v20 }
 0x429   : > { %v1872_v32 = vpop.f32.mrf.mxu2 }
 0x42a   : > { %v1873_v24 = vadd.f32 %v1872_v32, %v1843_v57 }
 0x42b   : > { %v1848_v10 = vpop.f32.mrf.mxu1 }
 0x42c   : > { %v1902_v28 = vadd.f32 %v1901_v35, %v1873_v24 }
 0x42e   : > { %v1914_v2 = vadd.f32 %v1902_v28, %v1739_v49 }
 0x430   : > { %1922 = vst [vmem:[#allocation5 + $0x18] sm:$0xff] %v1914_v2 }
 0x431   : > { %v1875_v26 = vpop.f32.mrf.mxu2 }
 0x432   : > { %v1876_v53 = vadd.f32 %v1875_v26, %v1846_v36 }
 0x434   : > { %v1905_v37 = vadd.f32 %v1904_v17, %v1876_v53 }
 0x436   : > { %v1915_v41 = vadd.f32 %v1905_v37, %v1740_v43 }
 0x438   : > { %1923 = vst [vmem:[#allocation5 + $0x10] sm:$0xff] %v1915_v41 }
 0x439   : > { %v1877_v18 = vpop.f32.mrf.mxu2 }
 0x43a   : > { %v1878_v44 = vadd.f32 %v1877_v18, %v1848_v10 }
 0x43c   : > { %v1907_v45 = vadd.f32 %v1906_v6, %v1878_v44 }
 0x43e   : > { %v1916_v13 = vadd.f32 %v1907_v45, %v1741_v30 }
 0x440   : > { %1924 = vst [vmem:[#allocation5 + $0x8] sm:$0xff] %v1916_v13 }
 0x441 PF: > { %1927 = sbr.rel (%p465_p4) target bundleno = 1600 (0x640), region = 92 }
 0x446   : > { %v3568_v16 = vld [vmem:[%s5249_s11 + $0x38] sm:$0xff]  ;;  %v3567_v47 = vld [vmem:[%s5249_s11 + $0x30] sm:$0xff]  ;;  %v3566_v46 = vld [vmem:[%s5249_s11 + $0x28] sm:$0xff] }
 0x447   : > { %2192 = vmatpush.bf16.msra.mxu0 %v3568_v16  ;;  %3956 = vmatpush.bf16.msra.mxu1 %v3568_v16  ;;  %v3565_v14 = vld [vmem:[%s5249_s11 + $0x20] sm:$0xff]  ;;  %v3564_v5 = vld [vmem:[%s5249_s11 + $0x18] sm:$0xff]  ;;  %v3563_v34 = vld [vmem:[%s5249_s11 + $0x10] sm:$0xff] }
 0x448   : > { %3958 = vmatpush.bf16.msra.mxu3 %v3568_v16  ;;  %3957 = vmatpush.bf16.msra.mxu2 %v3568_v16  ;;  %v3562_v19 = vld [vmem:[%s5249_s11 + $0x8] sm:$0xff]  ;;  %v3561_v22 = vld [vmem:[%s5249_s11] sm:$0xff]  ;;  %v3537_v61 = vld [vmem:[#allocation2 + $0xb0] sm:$0xff] }
 0x449   : > { %v3546_v1 = vld [vmem:[#allocation2 + $0x90] sm:$0xff]  ;;  %v3556_v40 = vld [vmem:[#allocation2 + $0x58] sm:$0xff]  ;;  %v3538_v12 = vld [vmem:[#allocation2] sm:$0xff] }
 0x44a   : > { %v3551_v23 = vld [vmem:[#allocation2 + $0x70] sm:$0xff]  ;;  %v3547_v48 = vld [vmem:[#allocation2 + $0x18] sm:$0xff]  ;;  %v3557_v21 = vld [vmem:[#allocation2 + $0x80] sm:$0xff] }
 0x44b   : > { %2193 = vmatpush.bf16.msra.mxu0 %v3567_v47  ;;  %3959 = vmatpush.bf16.msra.mxu1 %v3567_v47  ;;  %v3552_v38 = vld [vmem:[#allocation2 + $0xa0] sm:$0xff]  ;;  %v3539_v42 = vld [vmem:[#allocation2 + $0x10] sm:$0xff]  ;;  %v3548_v39 = vld [vmem:[#allocation2 + $0x98] sm:$0xff] }
 0x44c   : > { %3961 = vmatpush.bf16.msra.mxu3 %v3567_v47  ;;  %3960 = vmatpush.bf16.msra.mxu2 %v3567_v47  ;;  %v3558_v33 = vld [vmem:[#allocation2 + $0xb8] sm:$0xff]  ;;  %v3553_v4 = vld [vmem:[#allocation2 + $0xa8] sm:$0xff]  ;;  %v3559_v35 = vld [vmem:[#allocation2 + $0x20] sm:$0xff] }
 0x44d   : > { %v3540_v57 = vld [vmem:[#allocation2 + $0x48] sm:$0xff]  ;;  %v3549_v20 = vld [vmem:[#allocation2 + $0x38] sm:$0xff]  ;;  %v3541_v24 = vld [vmem:[#allocation2 + $0x60] sm:$0xff] }
 0x44e   : > { %v3554_v32 = vld [vmem:[#allocation2 + $0x68] sm:$0xff]  ;;  %v3550_v49 = vld [vmem:[#allocation2 + $0x50] sm:$0xff]  ;;  %v3543_v26 = vld [vmem:[#allocation2 + $0x40] sm:$0xff] }
 0x44f   : > { %2194 = vmatpush.bf16.msra.mxu0 %v3566_v46  ;;  %3962 = vmatpush.bf16.msra.mxu1 %v3566_v46  ;;  %v3560_v28 = vld [vmem:[#allocation2 + $0x8] sm:$0xff]  ;;  %v3555_v2 = vld [vmem:[#allocation2 + $0x30] sm:$0xff]  ;;  %v3544_v17 = vld [vmem:[#allocation2 + $0x78] sm:$0xff] }
 0x450   : > { %3964 = vmatpush.bf16.msra.mxu3 %v3566_v46  ;;  %3963 = vmatpush.bf16.msra.mxu2 %v3566_v46  ;;  %v3542_v36 = vld [vmem:[#allocation2 + $0x28] sm:$0xff]  ;;  %v4873_v41 = vld [vmem:[%s5250_s12] ss:$0 sm:$0xff] }
 0x451   : > { %v3545_v53 = vld [vmem:[#allocation2 + $0x88] sm:$0xff] }
 0x453   : > { %2195 = vmatpush.bf16.msra.mxu0 %v3565_v14  ;;  %3965 = vmatpush.bf16.msra.mxu1 %v3565_v14 }
 0x454   : > { %3967 = vmatpush.bf16.msra.mxu3 %v3565_v14  ;;  %3966 = vmatpush.bf16.msra.mxu2 %v3565_v14 }
 0x457   : > { %2196 = vmatpush.bf16.msra.mxu0 %v3564_v5  ;;  %3968 = vmatpush.bf16.msra.mxu1 %v3564_v5 }
 0x458   : > { %3970 = vmatpush.bf16.msra.mxu3 %v3564_v5  ;;  %3969 = vmatpush.bf16.msra.mxu2 %v3564_v5 }
 0x45b   : > { %2197 = vmatpush.bf16.msra.mxu0 %v3563_v34  ;;  %3971 = vmatpush.bf16.msra.mxu1 %v3563_v34 }
 0x45c   : > { %3973 = vmatpush.bf16.msra.mxu3 %v3563_v34  ;;  %3972 = vmatpush.bf16.msra.mxu2 %v3563_v34 }
 0x45f   : > { %2198 = vmatpush.bf16.msra.mxu0 %v3562_v19  ;;  %3974 = vmatpush.bf16.msra.mxu1 %v3562_v19 }
 0x460   : > { %3976 = vmatpush.bf16.msra.mxu3 %v3562_v19  ;;  %3975 = vmatpush.bf16.msra.mxu2 %v3562_v19  ;;  %v5363_v19 = vld [vmem:[#allocation9_spill] sm:$0xff] }
 0x463   : > { %2199 = vmatpush.bf16.msra.mxu0 %v3561_v22  ;;  %3977 = vmatpush.bf16.msra.mxu1 %v3561_v22 }
 0x464   : > { %3979 = vmatpush.bf16.msra.mxu3 %v3561_v22  ;;  %3978 = vmatpush.bf16.msra.mxu2 %v3561_v22 }
 0x466   : > { %2200 = vmatmul.bf16.vlgmr.msra.gmra.mxu0 %v3537_v61  ;;  %2245 = vmatmul.bf16.vlgmr.msra.gmra.mxu1 %v3546_v1  ;;  %v5365_v1 = vld [vmem:[#allocation10_spill] sm:$0xff] }
 0x467   : > { %2295 = vmatmul.bf16.vlgmr.msra.gmra.mxu3 %v3556_v40  ;;  %2270 = vmatmul.bf16.vlgmr.msra.gmra.mxu2 %v3551_v23 }
 0x476   : > { %2205 = vmatmul.bf16.gmra.mxu0 %v3538_v12  ;;  %2250 = vmatmul.bf16.gmra.mxu1 %v3547_v48 }
 0x477   : > { %2300 = vmatmul.bf16.gmra.mxu3 %v3557_v21  ;;  %2275 = vmatmul.bf16.gmra.mxu2 %v3552_v38 }
 0x486   : > { %2210 = vmatmul.bf16.gmra.mxu0 %v3539_v42  ;;  %2255 = vmatmul.bf16.gmra.mxu1 %v3548_v39 }
 0x487   : > { %2305 = vmatmul.bf16.gmra.mxu3 %v3558_v33  ;;  %2280 = vmatmul.bf16.gmra.mxu2 %v3553_v4 }
 0x496   : > { %2215 = vmatmul.bf16.gmra.mxu0 %v3540_v57  ;;  %2260 = vmatmul.bf16.gmra.mxu1 %v3549_v20 }
 0x497   : > { %2310 = vmatmul.bf16.gmra.mxu3 %v3559_v35  ;;  %2285 = vmatmul.bf16.gmra.mxu2 %v3554_v32 }
 0x4a6   : > { %2220 = vmatmul.bf16.gmra.mxu0 %v3541_v24  ;;  %2265 = vmatmul.bf16.gmra.mxu1 %v3550_v49  ;;  %v5367_v24 = vld [vmem:[#allocation18_spill] sm:$0xff] }
 0x4a7   : > { %2315 = vmatmul.bf16.gmra.mxu3 %v3560_v28  ;;  %2290 = vmatmul.bf16.gmra.mxu2 %v3555_v2 }
 0x4b6   : > { %2225 = vmatmul.bf16.gmra.mxu0 %v3542_v36  ;;  %v5368_v36 = vld [vmem:[#allocation21_spill] sm:$0xff] }
 0x4c6   : > { %2230 = vmatmul.bf16.gmra.mxu0 %v3543_v26 }
 0x4d6   : > { %2235 = vmatmul.bf16.gmra.mxu0 %v3544_v17 }
 0x4e3   : > { %v2201_v43 = vpop.f32.mrf.mxu0  ;;  %v2246_v37 = vpop.f32.mrf.mxu1 }
 0x4e4   : > { %v2202_v10 = vadd.f32 %v4873_v41, %v2201_v43  ;;  %v2247_v18 = vadd.f32 %v4873_v41, %v2246_v37 }
 0x4e6   : > { %2240 = vmatmul.bf16.gmra.mxu0 %v3545_v53  ;;  %v2321_v13 = vmax.f32 %v2202_v10, 0.0  ;;  %v2339_v16 = vmax.f32 %v2247_v18, 0.0  ;;  %v5374_v53 = vld [vmem:[#allocation20_spill] sm:$0xff] }
 0x4e8   : > { %v4881_v22 = vmul.f32 %v2321_v13, %v5363_v19  ;;  %v4897_v49 = vmul.f32 %v2339_v16, %v5367_v24 }
 0x4ea   : > { %v2296_v44 = vpop.f32.mrf.mxu3  ;;  %v2271_v30 = vpop.f32.mrf.mxu2  ;;  %5364 = vst [vmem:[#allocation39_spill] sm:$0xff] %v4881_v22 }
 0x4eb   : > { %v2203_v6 = vpop.f32.mrf.mxu0  ;;  %v2248_v45 = vpop.f32.mrf.mxu1  ;;  %v2297_v14 = vadd.f32 %v4873_v41, %v2296_v44  ;;  %v2272_v20 = vadd.f32 %v4873_v41, %v2271_v30 }
 0x4ec   : > { %v2204_v47 = vadd.f32 %v4873_v41, %v2203_v6  ;;  %v2249_v46 = vadd.f32 %v4873_v41, %v2248_v45 }
 0x4ed   : > { %v2359_v12 = vmax.f32 %v2297_v14, 0.0 }
 0x4ee   : > { %v2322_v5 = vmax.f32 %v2204_v47, 0.0  ;;  %v2340_v34 = vmax.f32 %v2249_v46, 0.0 }
 0x4ef   : > { %v4890_v4 = vmul.f32 %v2359_v12, %v4340_v60  ;;  %v2349_v60 = vmax.f32 %v2272_v20, 0.0 }
 0x4f0   : > { %v3745_v61 = vpack.c.bf16 %v2322_v5, %v2321_v13  ;;  %v4884_v40 = vmul.f32 %v2322_v5, %v5365_v1  ;;  %v3790_v23 = vpack.c.bf16 %v2340_v34, %v2339_v16  ;;  %v4904_v26 = vmul.f32 %v2340_v34, %v5368_v36  ;;  %v5369_v5 = vld [vmem:[#allocation11_spill] sm:$0xff] }
 0x4f2   : > { %5366 = vst [vmem:[#allocation40_spill] sm:$0xff] %v4884_v40  ;;  %v2298_v48 = vpop.f32.mrf.mxu3  ;;  %v2273_v21 = vpop.f32.mrf.mxu2  ;;  %v5381_v40 = vld [vmem:[#allocation34_spill] sm:$0xff] }
 0x4f3   : > { %3746 = vst [vmem:[#allocation2 + $0xb0] sm:$0xff] %v3745_v61   ;;  %v2299_v42 = vadd.f32 %v4873_v41, %v2298_v48  ;;  %v2206_v39 = vpop.f32.mrf.mxu0  ;;  %v2251_v33 = vpop.f32.mrf.mxu1  ;;  %v2274_v17 = vadd.f32 %v4873_v41, %v2273_v21  ;;  %v5371_v61 = vld [vmem:[#allocation12_spill] sm:$0xff] }
 0x4f4   : > { %3899 = vst [vmem:[#allocation2 + $0x90] sm:$0xff] %v3790_v23   ;;  %v2207_v28 = vadd.f32 %v4873_v41, %v2206_v39  ;;  %v4901_v2 = vadd.f32 %v4873_v41, %v2251_v33 }
 0x4f5   : > { %v2360_v57 = vmax.f32 %v2299_v42, 0.0  ;;  %v2350_v18 = vmax.f32 %v2274_v17, 0.0 }
 0x4f6   : > { %v2323_v44 = vmax.f32 %v2207_v28, 0.0  ;;  %v5297_v30 = vmax.f32 %v4901_v2, 0.0 }
 0x4f7   : > { %v3840_v35 = vpack.c.bf16 %v2360_v57, %v2359_v12  ;;  %v4894_v32 = vmul.f32 %v2360_v57, %v4348_v0  ;;  %v3815_v13 = vpack.c.bf16 %v2350_v18, %v2349_v60 }
 0x4f8   : > { %v4921_v34 = vmul.f32 %v2323_v44, %v5369_v5 }
 0x4f9   : > { %3909 = vst [vmem:[#allocation2 + $0x58] sm:$0xff] %v3840_v35  }
 0x4fa   : > { %v2301_v0 = vpop.f32.mrf.mxu3  ;;  %v2276_v43 = vpop.f32.mrf.mxu2  ;;  %3904 = vst [vmem:[#allocation2 + $0x70] sm:$0xff] %v3815_v13  }
 0x4fb   : > { %v2208_v37 = vpop.f32.mrf.mxu0  ;;  %v2253_v10 = vpop.f32.mrf.mxu1  ;;  %v4918_v14 = vadd.f32 %v4873_v41, %v2301_v0  ;;  %5370 = vst [vmem:[#allocation41_spill] sm:$0xff] %v4921_v34  ;;  %v2277_v12 = vadd.f32 %v4873_v41, %v2276_v43  ;;  %v2493_v43 = vmul.f32 %v2349_v60, %v4354_v3 }
 0x4fc   : > { %v2209_v6 = vadd.f32 %v4873_v41, %v2208_v37  ;;  %v4912_v45 = vadd.f32 %v4873_v41, %v2253_v10  ;;  %v2494_v37 = vmul.f32 %v2350_v18, %v4362_v7 }
 0x4fd   : > { %v5291_v39 = vmax.f32 %v4918_v14, 0.0  ;;  %v2351_v35 = vmax.f32 %v2277_v12, 0.0 }
 0x4fe   : > { %v2324_v47 = vmax.f32 %v2209_v6, 0.0  ;;  %v5294_v46 = vmax.f32 %v4912_v45, 0.0 }
 0x4ff   : > { %v2495_v36 = vmul.f32 %v2351_v35, %v4370_v11 }
 0x500   : > { %v3750_v19 = vpack.c.bf16 %v2324_v47, %v2323_v44  ;;  %v4924_v1 = vmul.f32 %v2324_v47, %v5371_v61  ;;  %v3795_v23 = vpack.c.bf16 %v5294_v46, %v5297_v30 }
 0x502   : > { %3891 = vst [vmem:[#allocation2] sm:$0xff] %v3750_v19   ;;  %v2303_v48 = vpop.f32.mrf.mxu3  ;;  %v2278_v21 = vpop.f32.mrf.mxu2 }
 0x503   : > { %3900 = vst [vmem:[#allocation2 + $0x18] sm:$0xff] %v3795_v23   ;;  %v4935_v33 = vadd.f32 %v4873_v41, %v2303_v48  ;;  %v2211_v57 = vpop.f32.mrf.mxu0  ;;  %v2256_v20 = vpop.f32.mrf.mxu1  ;;  %v2279_v24 = vadd.f32 %v4873_v41, %v2278_v21  ;;  %v2527_v23 = vpack.c.bf16 %v2494_v37, %v2493_v43  ;;  %v5372_v21 = vld [vmem:[#allocation13_spill] sm:$0xff] }
 0x504   : > { %v2212_v44 = vadd.f32 %v4873_v41, %v2211_v57  ;;  %v4949_v47 = vadd.f32 %v4873_v41, %v2256_v20 }
 0x505   : > { %v5288_v28 = vmax.f32 %v4935_v33, 0.0  ;;  %v2352_v17 = vmax.f32 %v2279_v24, 0.0 }
 0x506   : > { %v2325_v3 = vmax.f32 %v2212_v44, 0.0  ;;  %v2343_v60 = vmax.f32 %v4949_v47, 0.0 }
 0x507   : > { %v3845_v0 = vpack.c.bf16 %v5288_v28, %v5291_v39  ;;  %v2496_v10 = vmul.f32 %v2352_v17, %v4378_v15  ;;  %v3820_v6 = vpack.c.bf16 %v2352_v17, %v2351_v35  ;;  %v5373_v35 = vld [vmem:[#allocation16_spill] sm:$0xff] }
 0x508   : > { %v4961_v57 = vmul.f32 %v2325_v3, %v5372_v21 }
 0x509   : > { %3910 = vst [vmem:[#allocation2 + $0x80] sm:$0xff] %v3845_v0   ;;  %v2528_v13 = vpack.c.bf16 %v2496_v10, %v2495_v36 }
 0x50a   : > { %v2306_v11 = vpop.f32.mrf.mxu3  ;;  %v2281_v5 = vpop.f32.mrf.mxu2  ;;  %3905 = vst [vmem:[#allocation2 + $0xa0] sm:$0xff] %v3820_v6  }
 0x50b   : > { %v2213_v19 = vpop.f32.mrf.mxu0  ;;  %v2258_v61 = vpop.f32.mrf.mxu1  ;;  %2654 = vmatpush.bf16.msrb.mxu2 %v2528_v13  ;;  %v4958_v48 = vadd.f32 %v4873_v41, %v2306_v11  ;;  %v4978_v11 = vadd.f32 %v4873_v41, %v2281_v5 }
 0x50c   : > { %v2214_v7 = vadd.f32 %v4873_v41, %v2213_v19  ;;  %v4953_v15 = vadd.f32 %v4873_v41, %v2258_v61 }
 0x50d   : > { %v5293_v37 = vmax.f32 %v4958_v48, 0.0 }
 0x50e   : > { %v2326_v18 = vmax.f32 %v2214_v7, 0.0  ;;  %v5298_v12 = vmax.f32 %v4953_v15, 0.0 }
 0x50f   : > { %2655 = vmatpush.bf16.msrb.mxu2 %v2527_v23  ;;  %v5290_v23 = vmax.f32 %v4978_v11, 0.0 }
 0x510   : > { %v3755_v20 = vpack.c.bf16 %v2326_v18, %v2325_v3  ;;  %v4964_v24 = vmul.f32 %v2326_v18, %v5373_v35  ;;  %v3800_v36 = vpack.c.bf16 %v5298_v12, %v2343_v60 }
 0x512   : > { %3892 = vst [vmem:[#allocation2 + $0x10] sm:$0xff] %v3755_v20   ;;  %v2308_v17 = vpop.f32.mrf.mxu3  ;;  %v2283_v0 = vpop.f32.mrf.mxu2 }
 0x513   : > { %3901 = vst [vmem:[#allocation2 + $0x98] sm:$0xff] %v3800_v36   ;;  %v4974_v10 = vadd.f32 %v4873_v41, %v2308_v17  ;;  %v2216_v44 = vpop.f32.mrf.mxu0  ;;  %v2261_v6 = vpop.f32.mrf.mxu1  ;;  %v4987_v3 = vadd.f32 %v4873_v41, %v2283_v0 }
 0x514   : > { %v2217_v61 = vadd.f32 %v4873_v41, %v2216_v44  ;;  %v2262_v7 = vadd.f32 %v4873_v41, %v2261_v6 }
 0x515   : > { %v5292_v13 = vmax.f32 %v4974_v10, 0.0  ;;  %v5289_v35 = vmax.f32 %v4987_v3, 0.0 }
 0x516   : > { %v2327_v36 = vmax.f32 %v2217_v61, 0.0  ;;  %v2345_v0 = vmax.f32 %v2262_v7, 0.0 }
 0x517   : > { %v3850_v19 = vpack.c.bf16 %v5292_v13, %v5293_v37  ;;  %v3825_v44 = vpack.c.bf16 %v5289_v35, %v5290_v23 }
 0x518   : > { %v4998_v6 = vmul.f32 %v2327_v36, %v4366_v9 }
 0x519   : > { %3911 = vst [vmem:[#allocation2 + $0xb8] sm:$0xff] %v3850_v19  }
 0x51a   : > { %v2311_v18 = vpop.f32.mrf.mxu3  ;;  %v2286_v21 = vpop.f32.mrf.mxu2  ;;  %3906 = vst [vmem:[#allocation2 + $0xa8] sm:$0xff] %v3825_v44  }
 0x51b   : > { %v2218_v20 = vpop.f32.mrf.mxu0  ;;  %v2263_v5 = vpop.f32.mrf.mxu1 }
 0x51c   : > { %v2219_v17 = vadd.f32 %v4873_v41, %v2218_v20  ;;  %v2264_v38 = vadd.f32 %v4873_v41, %v2263_v5  ;;  %v2312_v20 = vadd.f32 %v4873_v41, %v2311_v18 }
 0x51e   : > { %v2328_v19 = vmax.f32 %v2219_v17, 0.0  ;;  %v2346_v42 = vmax.f32 %v2264_v38, 0.0  ;;  %v2365_v9 = vmax.f32 %v2312_v20, 0.0 }
 0x520   : > { %v3760_v43 = vpack.c.bf16 %v2328_v19, %v2327_v36  ;;  %v5001_v16 = vmul.f32 %v2328_v19, %v5374_v53  ;;  %v3805_v61 = vpack.c.bf16 %v2346_v42, %v2345_v0  ;;  %v5009_v53 = vadd.f32 %v4873_v41, %v2286_v21 }
 0x521   : > { %v2490_v46 = vmul.f32 %v2346_v42, %v4330_v55  ;;  %v5375_v42 = vld [vmem:[#allocation31_spill] sm:$0xff] }
 0x522   : > { %3893 = vst [vmem:[#allocation2 + $0x48] sm:$0xff] %v3760_v43   ;;  %v2313_v5 = vpop.f32.mrf.mxu3  ;;  %v2288_v28 = vpop.f32.mrf.mxu2 }
 0x523   : > { %3902 = vst [vmem:[#allocation2 + $0x38] sm:$0xff] %v3805_v61   ;;  %v2314_v38 = vadd.f32 %v4873_v41, %v2313_v5  ;;  %v2221_v7 = vpop.f32.mrf.mxu0  ;;  %v2266_v17 = vpop.f32.mrf.mxu1  ;;  %v5012_v43 = vadd.f32 %v4873_v41, %v2288_v28  ;;  %v5296_v5 = vmax.f32 %v5009_v53, 0.0 }
 0x524   : > { %v2267_v36 = vadd.f32 %v4873_v41, %v2266_v17  ;;  %v5015_v18 = vadd.f32 %v4873_v41, %v2221_v7 }
 0x525   : > { %v2366_v44 = vmax.f32 %v2314_v38, 0.0  ;;  %v5295_v20 = vmax.f32 %v5012_v43, 0.0 }
 0x526   : > { %v2347_v61 = vmax.f32 %v2267_v36, 0.0  ;;  %v5299_v36 = vmax.f32 %v5015_v18, 0.0 }
 0x527   : > { %v3855_v19 = vpack.c.bf16 %v2366_v44, %v2365_v9  ;;  %v3830_v28 = vpack.c.bf16 %v5295_v20, %v5296_v5 }
 0x529   : > { %3912 = vst [vmem:[#allocation2 + $0x20] sm:$0xff] %v3855_v19   ;;  %v2491_v19 = vmul.f32 %v2347_v61, %v4338_v59 }
 0x52a   : > { %v2316_v35 = vpop.f32.mrf.mxu3  ;;  %v2291_v38 = vpop.f32.mrf.mxu2  ;;  %3907 = vst [vmem:[#allocation2 + $0x68] sm:$0xff] %v3830_v28   ;;  %v2487_v28 = vmul.f32 %v2343_v60, %v5375_v42  ;;  %v5382_v42 = vld [vmem:[#allocation24_spill] sm:$0xff] }
 0x52b   : > { %v2223_v23 = vpop.f32.mrf.mxu0  ;;  %v2268_v17 = vpop.f32.mrf.mxu1  ;;  %v2317_v7 = vadd.f32 %v4873_v41, %v2316_v35  ;;  %v2292_v12 = vadd.f32 %v4873_v41, %v2291_v38 }
 0x52c   : > { %v5020_v21 = vadd.f32 %v4873_v41, %v2223_v23  ;;  %v2269_v39 = vadd.f32 %v4873_v41, %v2268_v17  ;;  %v2489_v23 = vmul.f32 %v2345_v0, %v4322_v51 }
 0x52d   : > { %v2367_v5 = vmax.f32 %v2317_v7, 0.0 }
 0x52e   : > { %v5300_v13 = vmax.f32 %v5020_v21, 0.0  ;;  %v2348_v37 = vmax.f32 %v2269_v39, 0.0  ;;  %v2525_v7 = vpack.c.bf16 %v2490_v46, %v2489_v23  ;;  %v5383_v46 = vmax.f32 %v4901_v2, 0.0  ;;  %v5388_v2 = vld [vmem:[#allocation22_spill] sm:$0xff] }
 0x530   : > { %v3765_v17 = vpack.c.bf16 %v5300_v13, %v5299_v36  ;;  %v3810_v20 = vpack.c.bf16 %v2348_v37, %v2347_v61  ;;  %v2492_v35 = vmul.f32 %v2348_v37, %v4346_v63  ;;  %v5376_v61 = vld [vmem:[#allocation33_spill] sm:$0xff]  ;;  %v5377_v63 = vmax.f32 %v4953_v15, 0.0  ;;  %v5379_v36 = vld [vmem:[#allocation26_spill] sm:$0xff] }
 0x531   : > { %v5380_v13 = vld [vmem:[#allocation30_spill] sm:$0xff]  ;;  %v2485_v23 = vmul.f32 %v5383_v46, %v5382_v42 }
 0x532   : > { %3894 = vst [vmem:[#allocation2 + $0x60] sm:$0xff] %v3765_v17   ;;  %v2318_v30 = vpop.f32.mrf.mxu3  ;;  %v2526_v59 = vpack.c.bf16 %v2492_v35, %v2491_v19  ;;  %v2293_v39 = vpop.f32.mrf.mxu2  ;;  %v2488_v37 = vmul.f32 %v5377_v63, %v5376_v61  ;;  %v5378_v19 = vld [vmem:[#allocation32_spill] sm:$0xff]  ;;  %v2357_v35 = vmax.f32 %v2292_v12, 0.0  ;;  %v2510_v22 = vmul.f32 %v2366_v44, %v5380_v13 }
 0x533   : > { %3903 = vst [vmem:[#allocation2 + $0x50] sm:$0xff] %v3810_v20   ;;  %v2319_v51 = vadd.f32 %v4873_v41, %v2318_v30  ;;  %v2226_v0 = vpop.f32.mrf.mxu0  ;;  %v2294_v55 = vadd.f32 %v4873_v41, %v2293_v39  ;;  %v2511_v17 = vmul.f32 %v2367_v5, %v5378_v19  ;;  %v2509_v30 = vmul.f32 %v2365_v9, %v5379_v36 }
 0x534   : > { %2656 = vmatpush.bf16.msrb.mxu2 %v2526_v59  ;;  %v2524_v47 = vpack.c.bf16 %v2488_v37, %v2487_v28  ;;  %v5384_v59 = vld [vmem:[#allocation28_spill] sm:$0xff]  ;;  %v5385_v12 = vmax.f32 %v4912_v45, 0.0  ;;  %v5058_v9 = vadd.f32 %v4873_v41, %v2226_v0  ;;  %v5390_v37 = vld [vmem:[#allocation15_spill] sm:$0xff]  ;;  %v5392_v19 = vmax.f32 %v4935_v33, 0.0 }
 0x535   : > { %v2368_v38 = vmax.f32 %v2319_v51, 0.0  ;;  %v2358_v20 = vmax.f32 %v2294_v55, 0.0  ;;  %v5389_v55 = vmax.f32 %v4974_v10, 0.0  ;;  %v5394_v33 = vmax.f32 %v5009_v53, 0.0 }
 0x536   : > { %v2486_v51 = vmul.f32 %v5385_v12, %v5384_v59  ;;  %v2331_v45 = vmax.f32 %v5058_v9, 0.0  ;;  %v5399_v59 = vld [vmem:[#allocation29_spill] sm:$0xff] }
 0x537   : > { %v3860_v39 = vpack.c.bf16 %v2368_v38, %v2367_v5  ;;  %v2512_v34 = vmul.f32 %v2368_v38, %v5381_v40  ;;  %v3835_v60 = vpack.c.bf16 %v2358_v20, %v2357_v35  ;;  %v2535_v40 = vpack.c.bf16 %v2510_v22, %v2509_v30  ;;  %v5386_v5 = vld [vmem:[#allocation19_spill] sm:$0xff]  ;;  %v3415_v12 = vld [vmem:[%s5241_s3 + $0x8] sm:$0xf] }
 0x538   : > { %2657 = vmatpush.bf16.msrb.mxu2 %v2525_v7  ;;  %v2508_v28 = vmul.f32 %v5389_v55, %v5388_v2  ;;  %v2523_v0 = vpack.c.bf16 %v2486_v51, %v2485_v23  ;;  %v5391_v22 = vmax.f32 %v4918_v14, 0.0  ;;  %v5393_v38 = vpack.c.bf16 %v4904_v26, %v4897_v49  ;;  %v5397_v23 = vld [vmem:[#allocation25_spill] sm:$0xff]  ;;  %v3571_v51 = vld [vmem:[%s5241_s3 + $0x10] sm:$0xf0] }
 0x539   : > { %3913 = vst [vmem:[#allocation2 + $0x8] sm:$0xff] %v3860_v39   ;;  %v2536_v15 = vpack.c.bf16 %v2512_v34, %v2511_v17  ;;  %v5387_v34 = vmax.f32 %v4958_v48, 0.0  ;;  %v2506_v48 = vmul.f32 %v5392_v19, %v4364_v8  ;;  %v2501_v39 = vmul.f32 %v2357_v35, %v4324_v52  ;;  %v5401_v19 = vld [vmem:[#allocation27_spill] sm:$0xff] }
 0x53a   : > { %3908 = vst [vmem:[#allocation2 + $0x30] sm:$0xff] %v3835_v60   ;;  %v2505_v7 = vmul.f32 %v5391_v22, %v5390_v37  ;;  %v2499_v8 = vmul.f32 %v5394_v33, %v4402_v27  ;;  %v5395_v60 = vmax.f32 %v5012_v43, 0.0  ;;  %v5396_v49 = vpack.c.bf16 %v4894_v32, %v4890_v4  ;;  %v3574_v37 = vld [vmem:[%s5241_s3 + $0x28] sm:$0xf0] }
 0x53b   : > { %2683 = vmatpush.bf16.msrb.mxu3 %v2536_v15  ;;  %v2228_v13 = vpop.f32.mrf.mxu0  ;;  %v2507_v36 = vmul.f32 %v5387_v34, %v5386_v5  ;;  %v5398_v27 = vmax.f32 %v4978_v11, 0.0  ;;  %v3416_v9 = vor.u32 %v3571_v51, %v3415_v12  ;;  %v3575_v51 = vld [vmem:[%s5241_s3 + $0x34] sm:$0xf] }
 0x53c   : > { %v2229_v44 = vadd.f32 %v4873_v41, %v2228_v13  ;;  %2658 = vmatpush.bf16.msrb.mxu2 %v2524_v47  ;;  %v2533_v30 = vpack.c.bf16 %v2506_v48, %v2505_v7  ;;  %v2502_v47 = vmul.f32 %v2358_v20, %v4332_v56  ;;  %v2500_v15 = vmul.f32 %v5395_v60, %v4410_v31  ;;  %v3569_v60 = vld [vmem:[%s5241_s3 + $0x4] sm:$0xf] }
 0x53d   : > { %v2534_v17 = vpack.c.bf16 %v2508_v28, %v2507_v36  ;;  %v2497_v53 = vmul.f32 %v5398_v27, %v5397_v23  ;;  %v5400_v31 = vmax.f32 %v4987_v3, 0.0  ;;  %v5411_v23 = vld [vmem:[#allocation40_spill] sm:$0xff]  ;;  %v5412_v27 = vld [vmem:[#allocation39_spill] sm:$0xff] }
 0x53e   : > { %v2332_v61 = vmax.f32 %v2229_v44, 0.0  ;;  %v2531_v42 = vpack.c.bf16 %v2502_v47, %v2501_v39  ;;  %v2530_v20 = vpack.c.bf16 %v2500_v15, %v2499_v8  ;;  %v5406_v8 = vld [vmem:[#allocation17_spill] sm:$0xff] }
 0x53f   : > { %2684 = vmatpush.bf16.msrb.mxu3 %v2535_v40  ;;  %v2498_v43 = vmul.f32 %v5400_v31, %v5399_v59  ;;  %v3451_v59 = vld [vmem:[%s5241_s3 + $0x50] sm:$0xf]  ;;  %v3580_v31 = vld [vmem:[%s5241_s3 + $0x58] sm:$0xf0] }
 0x540   : > { %v3770_v63 = vpack.c.bf16 %v2332_v61, %v2331_v45  ;;  %2659 = vmatpush.bf16.msrb.mxu2 %v2523_v0 }
 0x541   : > { %v2529_v32 = vpack.c.bf16 %v2498_v43, %v2497_v53  ;;  %v5413_v53 = vpack.c.bf16 %v5411_v23, %v5412_v27  ;;  %v3452_v43 = vor.u32 %v3580_v31, %v3451_v59  ;;  %v2543_v59 = vld [vmem:[#allocation5 + $0x10] sm:$0xff] }
 0x542   : > { %3895 = vst [vmem:[#allocation2 + $0x28] sm:$0xff] %v3770_v63   ;;  %v3427_v63 = vld [vmem:[%s5241_s3 + $0x20] sm:$0xf] }
 0x543   : > { %2685 = vmatpush.bf16.msrb.mxu3 %v2534_v17  ;;  %v2231_v10 = vpop.f32.mrf.mxu0 }
 0x544   : > { %2660 = vmatpush.bf16.msrb.mxu2 %v5393_v38  ;;  %v2232_v14 = vadd.f32 %v4873_v41, %v2231_v10  ;;  %v5403_v38 = vld [vmem:[#allocation23_spill] sm:$0xff] }
 0x546   : > { %v2333_v35 = vmax.f32 %v2232_v14, 0.0 }
 0x547   : > { %2686 = vmatpush.bf16.msrb.mxu3 %v2533_v30  ;;  %v5404_v30 = vmax.f32 %v5015_v18, 0.0  ;;  %v3409_v18 = vld [vmem:[%s5241_s3 + $0xc] sm:$0xf0] }
 0x548   : > { %v2477_v0 = vmul.f32 %v2333_v35, %v4320_v50  ;;  %v5402_v50 = vmax.f32 %v5020_v21, 0.0 }
 0x549   : > { %v2473_v39 = vmul.f32 %v5404_v30, %v5403_v38 }
 0x54a   : > { %v2474_v48 = vmul.f32 %v5402_v50, %v5401_v19 }
 0x54b   : > { %2687 = vmatpush.bf16.msrb.mxu3 %v5396_v49  ;;  %v2233_v26 = vpop.f32.mrf.mxu0  ;;  %v3412_v49 = vor.u32 %v3569_v60, %v3409_v18 }
 0x54c   : > { %v2234_v52 = vadd.f32 %v4873_v41, %v2233_v26  ;;  %v2517_v47 = vpack.c.bf16 %v2474_v48, %v2473_v39  ;;  %v3439_v26 = vld [vmem:[%s5241_s3 + $0x38] sm:$0xf] }
 0x54e   : > { %v2334_v56 = vmax.f32 %v2234_v52, 0.0 }
 0x54f   : > { %2688 = vmatpush.bf16.msrb.mxu3 %v2531_v42  ;;  %v3577_v42 = vld [vmem:[%s5241_s3 + $0x40] sm:$0xf0] }
 0x550   : > { %v3775_v46 = vpack.c.bf16 %v2334_v56, %v2333_v35  ;;  %v2478_v2 = vmul.f32 %v2334_v56, %v4328_v54  ;;  %v2475_v54 = vmul.f32 %v2331_v45, %v4398_v25  ;;  %v5405_v45 = vld [vmem:[#allocation14_spill] sm:$0xff]  ;;  %v3440_v52 = vor.u32 %v3577_v42, %v3439_v26  ;;  %v5409_v56 = vld [vmem:[#allocation41_spill] sm:$0xff] }
 0x551   : > { %v5408_v35 = vpack.c.bf16 %v4964_v24, %v4961_v57  ;;  %v3572_v57 = vld [vmem:[%s5241_s3 + $0x1c] sm:$0xf]  ;;  %v2541_v42 = vld [vmem:[#allocation5] sm:$0xff] }
 0x552   : > { %3896 = vst [vmem:[#allocation2 + $0x40] sm:$0xff] %v3775_v46   ;;  %v2519_v22 = vpack.c.bf16 %v2478_v2, %v2477_v0  ;;  %v3579_v2 = vld [vmem:[%s5241_s3 + $0x50] sm:$0xf0] }
 0x553   : > { %v2236_v4 = vpop.f32.mrf.mxu0  ;;  %2689 = vmatpush.bf16.msrb.mxu3 %v2530_v20  ;;  %v3570_v20 = vld [vmem:[%s5241_s3 + $0x8] sm:$0xf0] }
 0x554   : > { %v2237_v11 = vadd.f32 %v4873_v41, %v2236_v4  ;;  %v3419_v4 = vld [vmem:[%s5241_s3 + $0x18] sm:$0xf] }
 0x556   : > { %v2335_v3 = vmax.f32 %v2237_v11, 0.0 }
 0x557   : > { %2690 = vmatpush.bf16.msrb.mxu3 %v2529_v32  ;;  %v3573_v32 = vld [vmem:[%s5241_s3 + $0x20] sm:$0xf0] }
 0x558   : > { %v2479_v5 = vmul.f32 %v2335_v3, %v4336_v58  ;;  %v2476_v58 = vmul.f32 %v2332_v61, %v4406_v29  ;;  %v3420_v12 = vor.u32 %v3573_v32, %v3419_v4 }
 0x55a   : > { %2691 = vmatmul.bf16.vlgmr.msrb.gmra.mxu3 %v3416_v9  ;;  %v2518_v17 = vpack.c.bf16 %v2476_v58, %v2475_v54  ;;  %v3433_v9 = vld [vmem:[%s5241_s3 + $0x3c] sm:$0xf0] }
 0x55b   : > { %v2238_v13 = vpop.f32.mrf.mxu0  ;;  %v3436_v11 = vor.u32 %v3575_v51, %v3433_v9  ;;  %v2544_v51 = vld [vmem:[#allocation5 + $0x8] sm:$0xff] }
 0x55c   : > { %v2239_v40 = vadd.f32 %v4873_v41, %v2238_v13  ;;  %v3431_v13 = vld [vmem:[%s5241_s3 + $0x30] sm:$0xf] }
 0x55e   : > { %v2336_v44 = vmax.f32 %v2239_v40, 0.0 }
 0x560   : > { %v3780_v34 = vpack.c.bf16 %v2336_v44, %v2335_v3  ;;  %v2480_v36 = vmul.f32 %v2336_v44, %v4344_v62  ;;  %v3428_v62 = vor.u32 %v3574_v37, %v3427_v63  ;;  %v3576_v3 = vld [vmem:[%s5241_s3 + $0x38] sm:$0xf0]  ;;  %v3578_v44 = vld [vmem:[%s5241_s3 + $0x4c] sm:$0xf] }
 0x561   : > { %v3432_v40 = vor.u32 %v3576_v3, %v3431_v13 }
 0x562   : > { %3897 = vst [vmem:[#allocation2 + $0x78] sm:$0xff] %v3780_v34   ;;  %v2520_v55 = vpack.c.bf16 %v2480_v36, %v2479_v5  ;;  %v3445_v5 = vld [vmem:[%s5241_s3 + $0x54] sm:$0xf0]  ;;  %v3443_v36 = vld [vmem:[%s5241_s3 + $0x48] sm:$0xf] }
 0x563   : > { %v2241_v28 = vpop.f32.mrf.mxu0  ;;  %v3448_v34 = vor.u32 %v3578_v44, %v3445_v5 }
 0x564   : > { %2625 = vmatpush.bf16.msrb.mxu1 %v2520_v55  ;;  %v2242_v7 = vadd.f32 %v4873_v41, %v2241_v28  ;;  %v3444_v55 = vor.u32 %v3579_v2, %v3443_v36 }
 0x566   : > { %v2337_v29 = vmax.f32 %v2242_v7, 0.0 }
 0x568   : > { %2626 = vmatpush.bf16.msrb.mxu1 %v2519_v22  ;;  %v2481_v14 = vmul.f32 %v2337_v29, %v5405_v45  ;;  %v2537_v22 = vld [vmem:[#allocation5 + $0x38] sm:$0xff] }
 0x56a   : > { %2696 = vmatmul.bf16.gmra.mxu3 %v3428_v62 }
 0x56b   : > { %v2243_v10 = vpop.f32.mrf.mxu0 }
 0x56c   : > { %2627 = vmatpush.bf16.msrb.mxu1 %v2518_v17  ;;  %v2244_v61 = vadd.f32 %v4873_v41, %v2243_v10  ;;  %v5407_v41 = vpack.c.bf16 %v5001_v16, %v4998_v6  ;;  %v5410_v16 = vpack.c.bf16 %v4924_v1, %v5409_v56  ;;  %v3407_v6 = vld [vmem:[%s5241_s3] sm:$0xf]  ;;  %v3421_v1 = vld [vmem:[%s5241_s3 + $0x24] sm:$0xf0] }
 0x56d   : > { %v3408_v46 = vor.u32 %v3570_v20, %v3407_v6  ;;  %v3424_v24 = vor.u32 %v3572_v57, %v3421_v1  ;;  %v2538_v17 = vld [vmem:[#allocation5 + $0x20] sm:$0xff] }
 0x56e   : > { %v2338_v25 = vmax.f32 %v2244_v61, 0.0  ;;  %v2539_v61 = vld [vmem:[#allocation5 + $0x30] sm:$0xff] }
 0x570   : > { %2628 = vmatpush.bf16.msrb.mxu1 %v2517_v47  ;;  %v3785_v33 = vpack.c.bf16 %v2338_v25, %v2337_v29  ;;  %v2482_v21 = vmul.f32 %v2338_v25, %v5406_v8 }
 0x572   : > { %3898 = vst [vmem:[#allocation2 + $0x88] sm:$0xff] %v3785_v33   ;;  %v2521_v15 = vpack.c.bf16 %v2482_v21, %v2481_v14  ;;  %v2540_v21 = vld [vmem:[#allocation5 + $0x28] sm:$0xff] }
 0x574   : > { %2629 = vmatpush.bf16.msrb.mxu1 %v5407_v41  ;;  %2661 = vmatpush.bf16.msrb.mxu2 %v2521_v15 }
 0x577   : > { %2662 = vmatmul.bf16.vlgmr.msrb.gmra.mxu2 %v3412_v49 }
 0x578   : > { %2630 = vmatpush.bf16.msrb.mxu1 %v5408_v35 }
 0x57a   : > { %2701 = vmatmul.bf16.gmra.mxu3 %v3440_v52 }
 0x57c   : > { %2631 = vmatpush.bf16.msrb.mxu1 %v5410_v16 }
 0x580   : > { %2632 = vmatpush.bf16.msrb.mxu1 %v5413_v53 }
 0x583   : > { %2633 = vmatmul.bf16.vlgmr.msrb.gmra.mxu1 %v3408_v46  ;;  %v2542_v46 = vld [vmem:[#allocation5 + $0x18] sm:$0xff] }
 0x587   : > { %2667 = vmatmul.bf16.gmra.mxu2 %v3424_v24 }
 0x58a   : > { %2706 = vmatmul.bf16.gmra.mxu3 %v3452_v43 }
 0x593   : > { %2638 = vmatmul.bf16.gmra.mxu1 %v3420_v12 }
 0x597   : > { %2672 = vmatmul.bf16.gmra.mxu2 %v3436_v11 }
 0x5a3   : > { %2643 = vmatmul.bf16.gmra.mxu1 %v3432_v40 }
 0x5a7   : > { %2677 = vmatmul.bf16.gmra.mxu2 %v3448_v34 }
 0x5b3   : > { %2648 = vmatmul.bf16.gmra.mxu1 %v3444_v55 }
 0x5dd   : > { %v2692_v28 = vpop.f32.mrf.mxu3 }
 0x5e5   : > { %v2694_v63 = vpop.f32.mrf.mxu3 }
 0x5ed   : > { %v2697_v50 = vpop.f32.mrf.mxu3 }
 0x5f5   : > { %v2699_v25 = vpop.f32.mrf.mxu3 }
 0x5fa   : > { %v2663_v0 = vpop.f32.mrf.mxu2 }
 0x5fd   : > { %v2702_v15 = vpop.f32.mrf.mxu3 }
 0x600   : > { %v2634_v37 = vpop.f32.mrf.mxu1 }
 0x601   : > { %v2664_v58 = vadd.f32 %v2663_v0, %v2634_v37 }
 0x602   : > { %v2665_v62 = vpop.f32.mrf.mxu2 }
 0x603   : > { %v2693_v54 = vadd.f32 %v2692_v28, %v2664_v58 }
 0x605   : > { %v2712_v7 = vadd.f32 %v2693_v54, %v2537_v22  ;;  %v2704_v16 = vpop.f32.mrf.mxu3 }
 0x607   : > { %2720 = vst [vmem:[#allocation5 + $0x38] sm:$0xff] %v2712_v7 }
 0x608   : > { %v2636_v19 = vpop.f32.mrf.mxu1 }
 0x609   : > { %v2666_v48 = vadd.f32 %v2665_v62, %v2636_v19 }
 0x60a   : > { %v2668_v10 = vpop.f32.mrf.mxu2 }
 0x60b   : > { %v2695_v38 = vadd.f32 %v2694_v63, %v2666_v48 }
 0x60d   : > { %v2713_v30 = vadd.f32 %v2695_v38, %v2538_v17  ;;  %v2707_v1 = vpop.f32.mrf.mxu3 }
 0x60f   : > { %2721 = vst [vmem:[#allocation5 + $0x20] sm:$0xff] %v2713_v30 }
 0x610   : > { %v2639_v39 = vpop.f32.mrf.mxu1 }
 0x611   : > { %v2669_v29 = vadd.f32 %v2668_v10, %v2639_v39 }
 0x612   : > { %v2670_v47 = vpop.f32.mrf.mxu2 }
 0x613   : > { %v2698_v45 = vadd.f32 %v2697_v50, %v2669_v29 }
 0x615   : > { %v2714_v14 = vadd.f32 %v2698_v45, %v2539_v61  ;;  %v2709_v9 = vpop.f32.mrf.mxu3 }
 0x617   : > { %2722 = vst [vmem:[#allocation5 + $0x30] sm:$0xff] %v2714_v14 }
 0x618   : > { %v2641_v33 = vpop.f32.mrf.mxu1 }
 0x619   : > { %v2671_v8 = vadd.f32 %v2670_v47, %v2641_v33 }
 0x61a   : > { %v2673_v60 = vpop.f32.mrf.mxu2 }
 0x61b   : > { %v2700_v18 = vadd.f32 %v2699_v25, %v2671_v8 }
 0x61d   : > { %v2715_v49 = vadd.f32 %v2700_v18, %v2540_v21 }
 0x61f   : > { %2723 = vst [vmem:[#allocation5 + $0x28] sm:$0xff] %v2715_v49 }
 0x620   : > { %v2644_v41 = vpop.f32.mrf.mxu1 }
 0x621   : > { %v2674_v26 = vadd.f32 %v2673_v60, %v2644_v41 }
 0x622   : > { %v2675_v35 = vpop.f32.mrf.mxu2 }
 0x623   : > { %v2703_v52 = vadd.f32 %v2702_v15, %v2674_v26 }
 0x625   : > { %v2716_v56 = vadd.f32 %v2703_v52, %v2541_v42 }
 0x627   : > { %2724 = vst [vmem:[#allocation5] sm:$0xff] %v2716_v56 }
 0x628   : > { %v2646_v6 = vpop.f32.mrf.mxu1 }
 0x629   : > { %v2676_v20 = vadd.f32 %v2675_v35, %v2646_v6 }
 0x62a   : > { %v2678_v53 = vpop.f32.mrf.mxu2 }
 0x62b   : > { %v2705_v23 = vadd.f32 %v2704_v16, %v2676_v20 }
 0x62d   : > { %v2717_v27 = vadd.f32 %v2705_v23, %v2542_v46 }
 0x62f   : > { %2725 = vst [vmem:[#allocation5 + $0x18] sm:$0xff] %v2717_v27 }
 0x630   : > { %v2649_v57 = vpop.f32.mrf.mxu1 }
 0x631   : > { %v2679_v24 = vadd.f32 %v2678_v53, %v2649_v57 }
 0x632   : > { %v2680_v32 = vpop.f32.mrf.mxu2 }
 0x633   : > { %v2708_v31 = vadd.f32 %v2707_v1, %v2679_v24 }
 0x635   : > { %v2718_v43 = vadd.f32 %v2708_v31, %v2543_v59 }
 0x637   : > { %2726 = vst [vmem:[#allocation5 + $0x10] sm:$0xff] %v2718_v43 }
 0x638   : > { %v2651_v4 = vpop.f32.mrf.mxu1 }
 0x639   : > { %v2681_v12 = vadd.f32 %v2680_v32, %v2651_v4 }
 0x63b   : > { %v2710_v11 = vadd.f32 %v2709_v9, %v2681_v12 }
 0x63d   : > { %v2719_v13 = vadd.f32 %v2710_v11, %v2544_v51 }
 0x63f   : > { %2727 = vst [vmem:[#allocation5 + $0x8] sm:$0xff] %v2719_v13 }
 0x640 PF: > { %v2741_v3 = vld [vmem:[%s5242_s4 + $0x10] sm:$0xff]  ;;  %v2739_v40 = vld [vmem:[%s5242_s4] sm:$0xff]  ;;  %v4077_v44 = vmov 0   ;;  %v2742_v34 = vld [vmem:[%s5242_s4 + $0x18] sm:$0xff] }
 0x641   : > { %4018 = vset.pattern.permute.xlu1 %v4077_v44  ;;  %4017 = vset.pattern.permute.xlu0 %v4077_v44  ;;  %v2743_v5 = vld [vmem:[%s5242_s4 + $0x20] sm:$0xff]  ;;  %v2740_v36 = vld [vmem:[%s5242_s4 + $0x8] sm:$0xff]  ;;  %v2746_v55 = vld [vmem:[%s5242_s4 + $0x38] sm:$0xff] }
 0x642   : > { %2759 = vperm.xlu1 %4018, %v2741_v3   ;;  %2749 = vperm.xlu0 %4017, %v2739_v40   ;;  %v2744_v2 = vld [vmem:[%s5242_s4 + $0x28] sm:$0xff]  ;;  %v2745_v28 = vld [vmem:[%s5242_s4 + $0x30] sm:$0xff]  ;;  %v2735_v0 = vld [vmem:[#allocation5] sm:$0xff] }
 0x643   : > { %4019 = vset.pattern.permute.xlu2 %v4077_v44  ;;  %v2736_v58 = vld [vmem:[#allocation5 + $0x18] sm:$0xff]  ;;  %v2733_v54 = vld [vmem:[#allocation5 + $0x30] sm:$0xff]  ;;  %v2734_v10 = vld [vmem:[#allocation5 + $0x28] sm:$0xff] }
 0x644   : > { %2769 = vperm.xlu2 %4019, %v2743_v5   ;;  %v2731_v7 = vld [vmem:[#allocation5 + $0x38] sm:$0xff]  ;;  %v2732_v38 = vld [vmem:[#allocation5 + $0x20] sm:$0xff]  ;;  %v2737_v25 = vld [vmem:[#allocation5 + $0x10] sm:$0xff] }
 0x646   : > { %v2738_v47 = vld [vmem:[#allocation5 + $0x8] sm:$0xff] }
 0x64a   : > { %2764 = vperm.xlu1 %4018, %v2742_v34   ;;  %2754 = vperm.xlu0 %4017, %v2740_v36  }
 0x64c   : > { %2774 = vperm.xlu2 %4019, %v2744_v2  }
 0x652   : > { %2784 = vperm.xlu1 %4018, %v2746_v55   ;;  %2779 = vperm.xlu0 %4017, %v2745_v28  }
 0x69e   : > { %v2770_v63 = vpop.permute.xlu2 %2769 }
 0x69f   : > { %v2791_v37 = vmul.f32 %v2770_v63, %v2735_v0 }
 0x6a1   : > { %2799 = vst [vmem:[#allocation4] sm:$0xff] %v2791_v37 }
 0x6a6   : > { %v2775_v22 = vpop.permute.xlu2 %2774 }
 0x6a7   : > { %v2792_v62 = vmul.f32 %v2775_v22, %v2736_v58 }
 0x6a8   : > { %v2811_v49 = vld [vmem:[#allocation4] sm:$0xff] (%p466_p5) }
 0x6a9   : > { %2800 = vst [vmem:[#allocation4 + $0x30] sm:$0xff] %v2792_v62 }
 0x6b0   : > { %v2812_v41 = vld [vmem:[#allocation4 + $0x30] sm:$0xff] (%p466_p5) }
 0x6b4   : > { %v2760_v19 = vpop.permute.xlu1 %2759  ;;  %v2750_v50 = vpop.permute.xlu0 %2749 }
 0x6b5   : > { %v2789_v48 = vmul.f32 %v2760_v19, %v2733_v54  ;;  %v2787_v17 = vmul.f32 %v2750_v50, %v2731_v7 }
 0x6b7   : > { %2797 = vst [vmem:[#allocation4 + $0x20] sm:$0xff] %v2789_v48 }
 0x6b8   : > { %2795 = vst [vmem:[#allocation4 + $0x18] sm:$0xff] %v2787_v17 }
 0x6bc   : > { %v2765_v30 = vpop.permute.xlu1 %2764  ;;  %v2755_v39 = vpop.permute.xlu0 %2754 }
 0x6bd   : > { %v2790_v29 = vmul.f32 %v2765_v30, %v2734_v10  ;;  %v2788_v61 = vmul.f32 %v2755_v39, %v2732_v38 }
 0x6be   : > { %v2809_v18 = vld [vmem:[#allocation4 + $0x20] sm:$0xff] (%p466_p5) }
 0x6bf   : > { %2798 = vst [vmem:[#allocation4 + $0x10] sm:$0xff] %v2790_v29  ;;  %v2807_v21 = vld [vmem:[#allocation4 + $0x18] sm:$0xff] (%p466_p5) }
 0x6c0   : > { %2796 = vst [vmem:[#allocation4 + $0x8] sm:$0xff] %v2788_v61  ;;  %v2815_v52 = vmax.f32 (%p466_p5), %v2807_v21, %v2811_v49 }
 0x6c4   : > { %v2785_v45 = vpop.permute.xlu1 %2784  ;;  %v2780_v14 = vpop.permute.xlu0 %2779  ;;  %2806 = sbr.rel (!%p466_p5) target bundleno = 1763 (0x6e3), region = 100 }
 0x6c5   : > { %v2794_v33 = vmul.f32 %v2785_v45, %v2738_v47  ;;  %v2793_v8 = vmul.f32 %v2780_v14, %v2737_v25 }
 0x6c6   : > { %v2810_v15 = vld [vmem:[#allocation4 + $0x10] sm:$0xff] (%p466_p5) }
 0x6c7   : > { %2802 = vst [vmem:[#allocation4 + $0x28] sm:$0xff] %v2794_v33  ;;  %v2808_v60 = vld [vmem:[#allocation4 + $0x8] sm:$0xff] (%p466_p5) }
 0x6c8   : > { %2801 = vst [vmem:[#allocation4 + $0x38] sm:$0xff] %v2793_v8  ;;  %v2816_v35 = vmax.f32 (%p466_p5), %v2808_v60, %v2812_v41 }
 0x6ca   : > { %v2819_v6 = vmax.f32 %v2815_v52, %v2816_v35 }
 0x6ce   : > { %v2814_v42 = vld [vmem:[#allocation4 + $0x28] sm:$0xff] }
 0x6cf   : > { %v2813_v26 = vld [vmem:[#allocation4 + $0x38] sm:$0xff]  ;;  %v2818_v16 = vmax.f32 %v2810_v15, %v2814_v42 }
 0x6d0   : > { %v2817_v56 = vmax.f32 %v2809_v18, %v2813_v26 }
 0x6d2   : > { %v2820_v20 = vmax.f32 %v2817_v56, %v2818_v16 }
 0x6d4   : > { %v2821_v46 = vmax.f32 %v2819_v6, %v2820_v20 }
 0x6d6   : > { %v2822_v23 = vrot.slane %v2821_v46, 4 }
 0x6d8   : > { %v2823_v27 = vmax.f32 %v2821_v46, %v2822_v23 }
 0x6da   : > { %v2824_v53 = vrot.slane %v2823_v27, 2 }
 0x6dc   : > { %v2825_v57 = vmax.f32 %v2823_v27, %v2824_v53 }
 0x6de   : > { %v2826_v1 = vrot.slane %v2825_v57, 1 }
 0x6e0   : > { %v2827_v24 = vmax.f32 %v2825_v57, %v2826_v1 }
 0x6e2   : > { %2828 = vst [vmem:[#allocation6] sm:$0x1] %v2827_v24 }
 0x6e3 PF: > { %p3984_p7 = scmp.eq.s32.totalorder %s2908_s28, 2  ;;  %s2837_s24 = sshll.u32 %s5251_s13, 4  ;;  %s2838_s24 = int_to_ptr.hbm [resolvable:$true] %s2837_s24 }
 0x6e4   : > { %s4078_s30 = smov [#allocation6]  }
 0x6e5   : > { %s2835_s14 = sshll.u32 %s4078_s30, 4  ;;  %s2836_s14 = int_to_ptr.vmem [resolvable:$true] %s2835_s14 }
 0x6e6   : > { %3981 = dma.vmem_to_hbm [thread:$0]  (%p3984_p7), %s2836_s14, 16, %s2838_s24, [#allocation7]  }
 0x6e7   : > { %4061 = dma.done.wait (%p3984_p7), [#allocation7], 16  }
 0x6e8   : > { %4063 = vsyncadd (%p3984_p7), [#allocation7], 4294967280 }
 0x6e9 PF: > { %s24_s27 = sadd.s32 1, %s4074_s27   ;;  %s5414_s25 = smov %s4070_s26 }
 0x6ea   : > { %p21_p8 = scmp.ge.s32.totalorder %s24_s27, 5   ;;  %s5415_s26 = smov %s5417_s29 }
 0x6ec   :  { %23 = sbr.rel (!%p21_p8) target bundleno = 2 (0x2), region = 132 }
 0x6f1   :  { %2851 = vsyncpa [#allocation7], 1 }
 0x6f2   :  { %2853 = vsyncpa [#allocation7 + $0x1], 1 }

</bundles_post_ra>
